<compile_context>
chip_gen: v7x
topology: tpu7x:2x2x1
jax: 0.10.0
libtpu: 0.0.40
codegen_flags: <defaults>
</compile_context>

<pallas_src>
import jax
import jax.numpy as jnp
from jax import lax
from jax.experimental import pallas as pl
from jax.experimental.pallas import tpu as pltpu

EPS = 1e-5
LANES = 128


def _round_up(x, m):
    return (x + m - 1) // m * m


def _pick_tile_h(h, w, max_rows=2048):
    """Largest divisor of h with tile_h*w output rows <= max_rows."""
    best = 1
    for th in range(1, h + 1):
        if h % th == 0 and th * w <= max_rows:
            best = th
    return best


def conv3_bn_relu_forward(x_nchw, params):
    """x_nchw: (N, Cin, H, W) f32  ->  (N, Cout, H, W) f32."""
    n, cin, h, w = x_nchw.shape
    w1, b1, w2, b2, w3, b3, wc, bc, gamma, beta = params
    cout = w1.shape[0]
    c_pad = _round_up(cout, LANES)

    # ---------------- host-side weight folding (exact identities) ----------------
    # (1) 3x3 + 1x3 + 3x1  ->  one 3x3 weight.
    w_fused = w1                                            # (Cout, Cin, 3, 3)
    w_fused = w_fused.at[:, :, 1, :].add(w2[:, :, 0, :])    # 1x3 -> middle row
    w_fused = w_fused.at[:, :, :, 1].add(w3[:, :, :, 0])    # 3x1 -> middle col
    # (2) fold the 1x1 conv: Wcomb[kh,kw,ci,p] = sum_o Wfused[o,ci,kh,kw]*Wc[p,o]
    wc00 = wc[:, :, 0, 0]                                   # (Cout, Cout)
    w_comb = jnp.einsum('oikl,po->klip', w_fused, wc00)     # (3,3,Cin,Cout)
    w_comb = w_comb.reshape(9, cin, cout)
    w_comb = jnp.pad(w_comb, ((0, 0), (0, 0), (0, c_pad - cout)))  # lane-dense
    # Conv biases (b1+b2+b3 and bc) are intentionally dropped: BatchNorm in
    # training mode subtracts the per-channel batch mean, which cancels any
    # per-channel constant exactly.

    gamma_p = jnp.pad(gamma, (0, c_pad - cout))
    beta_p = jnp.pad(beta, (0, c_pad - cout))

    # -------- halo row-tiles of the padded NHWC input (no 9x im2col) -------------
    tile_h = _pick_tile_h(h, w)
    num_t = h // tile_h
    rows = tile_h * w
    num_blocks = n * num_t

    x_nhwc = jnp.transpose(x_nchw, (0, 2, 3, 1))
    xp = jnp.pad(x_nhwc, ((0, 0), (1, 1), (1, 1), (0, 0)))  # (N, H+2, W+2, Cin)
    if num_t == 1:
        halo = xp[:, None]
    else:
        halo = jnp.stack(
            [xp[:, t * tile_h:t * tile_h + tile_h + 2] for t in range(num_t)],
            axis=1)
    halo = halo.reshape(num_blocks, tile_h + 2, w + 2, cin)

    # -------- phase 1: fused conv (one matmul chain) + per-tile BN statistics ----
    def conv_stats_kernel(x_ref, w_ref, y_ref, st_ref):
        acc = jnp.zeros((rows, c_pad), jnp.float32)
        for kh in range(3):
            for kw in range(3):
                win = x_ref[0, kh:kh + tile_h, kw:kw + w, :]   # (tile_h, W, Cin)
                win = win.reshape(rows, cin)
                acc = acc + jnp.dot(win, w_ref[kh * 3 + kw],
                                    preferred_element_type=jnp.float32)
        y_ref[0] = acc                                         # lane-dense store
        st_ref[0] = jnp.zeros((8, c_pad), jnp.float32)
        st_ref[0, 0:1, :] = jnp.sum(acc, axis=0, keepdims=True)        # sum
        st_ref[0, 1:2, :] = jnp.sum(acc * acc, axis=0, keepdims=True)  # sum of sq

    y_pre, stats = pl.pallas_call(
        conv_stats_kernel,
        out_shape=(
            jax.ShapeDtypeStruct((num_blocks, rows, c_pad), jnp.float32),
            jax.ShapeDtypeStruct((num_blocks, 8, c_pad), jnp.float32),
        ),
        grid=(num_blocks,),
        in_specs=[
            pl.BlockSpec((1, tile_h + 2, w + 2, cin), lambda b: (b, 0, 0, 0)),
            pl.BlockSpec((9, cin, c_pad), lambda b: (0, 0, 0)),
        ],
        out_specs=(
            pl.BlockSpec((1, rows, c_pad), lambda b: (b, 0, 0)),
            pl.BlockSpec((1, 8, c_pad), lambda b: (b, 0, 0)),
        ),
        compiler_params=pltpu.CompilerParams(
            dimension_semantics=("parallel",),
            vmem_limit_bytes=32 * 1024 * 1024),
    )(halo, w_comb)

    # ---- tiny glue reduction: partial stats -> per-channel affine (scale/shift) -
    m_total = jnp.float32(num_blocks * rows)                  # == N*H*W
    mean = jnp.sum(stats[:, 0, :], axis=0) / m_total
    var = jnp.maximum(jnp.sum(stats[:, 1, :], axis=0) / m_total - mean * mean, 0.0)
    inv = lax.rsqrt(var + EPS)                                # biased var (training BN)
    scale = (gamma_p * inv).reshape(1, c_pad)
    shift = (beta_p - mean * gamma_p * inv).reshape(1, c_pad)

    # -------- phase 2: y*scale + shift, ReLU (lane-dense, tiled) -----------------
    def bn_relu_kernel(y_ref, s_ref, t_ref, o_ref):
        o_ref[...] = jnp.maximum(y_ref[...] * s_ref[...] + t_ref[...], 0.0)

    out_flat = pl.pallas_call(
        bn_relu_kernel,
        out_shape=jax.ShapeDtypeStruct((num_blocks, rows, c_pad), jnp.float32),
        grid=(num_blocks,),
        in_specs=[
            pl.BlockSpec((1, rows, c_pad), lambda b: (b, 0, 0)),
            pl.BlockSpec((1, c_pad), lambda b: (0, 0)),
            pl.BlockSpec((1, c_pad), lambda b: (0, 0)),
        ],
        out_specs=pl.BlockSpec((1, rows, c_pad), lambda b: (b, 0, 0)),
        compiler_params=pltpu.CompilerParams(
            dimension_semantics=("parallel",),
            vmem_limit_bytes=32 * 1024 * 1024),
    )(y_pre, scale, shift)

    # -------- back to NCHW, drop channel padding ---------------------------------
    out = out_flat[:, :, :cout].reshape(n, num_t, tile_h, w, cout)
    out = out.reshape(n, h, w, cout)
    return jnp.transpose(out, (0, 3, 1, 2))


# ------------------------ pure-JAX reference (verification) ------------------------
def _ref_forward(x, params):
    w1, b1, w2, b2, w3, b3, wc, bc, gamma, beta = params

    def conv(x, w, b, pad):
        y = lax.conv_general_dilated(
            x, w, window_strides=(1, 1), padding=pad,
            dimension_numbers=("NCHW", "OIHW", "NCHW"))
        return y + b[None, :, None, None]

    x0 = conv(x, w1, b1, [(1, 1), (1, 1)])
    x1 = conv(x, w2, b2, [(0, 0), (1, 1)])
    x2 = conv(x, w3, b3, [(1, 1), (0, 0)])
    y = x0 + x1 + x2
    y = conv(y, wc, bc, [(0, 0), (0, 0)])
    mean = jnp.mean(y, axis=(0, 2, 3), keepdims=True)
    var = jnp.mean((y - mean) ** 2, axis=(0, 2, 3), keepdims=True)
    y = (y - mean) * lax.rsqrt(var + EPS)
    y = y * gamma[None, :, None, None] + beta[None, :, None, None]
    return jnp.maximum(y, 0.0)


def make_params(key, cin, cout):
    ks = jax.random.split(key, 8)
    w1 = 0.1 * jax.random.normal(ks[0], (cout, cin, 3, 3), jnp.float32)
    b1 = 0.1 * jax.random.normal(ks[1], (cout,), jnp.float32)
    w2 = 0.1 * jax.random.normal(ks[2], (cout, cin, 1, 3), jnp.float32)
    b2 = 0.1 * jax.random.normal(ks[3], (cout,), jnp.float32)
    w3 = 0.1 * jax.random.normal(ks[4], (cout, cin, 3, 1), jnp.float32)
    b3 = 0.1 * jax.random.normal(ks[5], (cout,), jnp.float32)
    wc = 0.1 * jax.random.normal(ks[6], (cout, cout, 1, 1), jnp.float32)
    bc = 0.1 * jax.random.normal(ks[7], (cout,), jnp.float32)
    gamma = jnp.ones((cout,), jnp.float32)   # PyTorch BatchNorm2d default init
    beta = jnp.zeros((cout,), jnp.float32)
    return (w1, b1, w2, b2, w3, b3, wc, bc, gamma, beta)


if __name__ == "__main__":
    key = jax.random.PRNGKey(0)
    k_x, k_p = jax.random.split(key)

    N, CIN, COUT, H, W = 2, 4, 8, 16, 16
    x = jax.random.normal(k_x, (N, CIN, H, W), jnp.float32)
    params = make_params(k_p, CIN, COUT)

    fwd = jax.jit(conv3_bn_relu_forward)
    out = jax.block_until_ready(fwd(x, params))

    ref = jax.block_until_ready(_ref_forward(x, params))
    assert out.shape == (N, COUT, H, W)
    assert float(jnp.max(jnp.abs(out - ref))) < 2e-4

    print("KERNEL_OK")
</pallas_src>

<mosaic_0001>
module attributes {stable_mosaic.version = 11 : i64} {
  func.func @bn_relu_kernel(%arg0: i32, %arg1: memref<1x256x128xf32, #tpu.memory_space<vmem>>, %arg2: memref<1x128xf32, #tpu.memory_space<vmem>>, %arg3: memref<1x128xf32, #tpu.memory_space<vmem>>, %arg4: memref<1x256x128xf32, #tpu.memory_space<vmem>>) attributes {dimension_semantics = [#tpu.dimension_semantics<parallel>], iteration_bounds = array<i64: 2>, scalar_prefetch = 0 : i64, scratch_operands = 0 : i64, tpu.core_type = #tpu.core_type<tc>, window_params = [{transform_indices = @transform_0, window_bounds = array<i64: 1, 256, 128>}, {pipeline_mode = #tpu.pipeline_mode<synchronous>, transform_indices = @transform_1, window_bounds = array<i64: 1, 128>}, {pipeline_mode = #tpu.pipeline_mode<synchronous>, transform_indices = @transform_2, window_bounds = array<i64: 1, 128>}, {transform_indices = @transform_3, window_bounds = array<i64: 1, 256, 128>}]} {
    %c0 = arith.constant 0 : index
    %c0_0 = arith.constant 0 : index
    %c0_1 = arith.constant 0 : index
    %0 = vector.load %arg1[%c0, %c0_0, %c0_1] : memref<1x256x128xf32, #tpu.memory_space<vmem>>, vector<1x256x128xf32>
    %c0_2 = arith.constant 0 : index
    %c0_3 = arith.constant 0 : index
    %1 = vector.load %arg2[%c0_2, %c0_3] : memref<1x128xf32, #tpu.memory_space<vmem>>, vector<1x128xf32>
    %2 = vector.shape_cast %1 : vector<1x128xf32> to vector<1x1x128xf32>
    %3 = vector.broadcast %2 : vector<1x1x128xf32> to vector<1x256x128xf32>
    %4 = arith.mulf %0, %3 : vector<1x256x128xf32>
    %c0_4 = arith.constant 0 : index
    %c0_5 = arith.constant 0 : index
    %5 = vector.load %arg3[%c0_4, %c0_5] : memref<1x128xf32, #tpu.memory_space<vmem>>, vector<1x128xf32>
    %6 = vector.shape_cast %5 : vector<1x128xf32> to vector<1x1x128xf32>
    %7 = vector.broadcast %6 : vector<1x1x128xf32> to vector<1x256x128xf32>
    %8 = arith.addf %4, %7 : vector<1x256x128xf32>
    %cst = arith.constant 0.000000e+00 : f32
    %9 = vector.broadcast %cst : f32 to vector<1x256x128xf32>
    %10 = arith.maximumf %8, %9 : vector<1x256x128xf32>
    %c0_6 = arith.constant 0 : index
    %c0_7 = arith.constant 0 : index
    %c0_8 = arith.constant 0 : index
    %11 = vector.load %arg4[%c0_6, %c0_7, %c0_8] : memref<1x256x128xf32, #tpu.memory_space<vmem>>, vector<1x256x128xf32>
    tpu.vector_store %arg4[%c0_6, %c0_7, %c0_8], %10 {strides = array<i32>} : memref<1x256x128xf32, #tpu.memory_space<vmem>>, vector<1x256x128xf32>,
    return
  }
  func.func @transform_0(%arg0: i32) -> (i32, i32, i32) {
    %c0_i32 = arith.constant 0 : i32
    %c0_i32_0 = arith.constant 0 : i32
    %c0_i32_1 = arith.constant 0 : i32
    return %arg0, %c0_i32, %c0_i32_0 : i32, i32, i32
  }
  func.func @transform_1(%arg0: i32) -> (i32, i32) {
    %c0_i32 = arith.constant 0 : i32
    %c0_i32_0 = arith.constant 0 : i32
    %c0_i32_1 = arith.constant 0 : i32
    return %c0_i32, %c0_i32_0 : i32, i32
  }
  func.func @transform_2(%arg0: i32) -> (i32, i32) {
    %c0_i32 = arith.constant 0 : i32
    %c0_i32_0 = arith.constant 0 : i32
    %c0_i32_1 = arith.constant 0 : i32
    return %c0_i32, %c0_i32_0 : i32, i32
  }
  func.func @transform_3(%arg0: i32) -> (i32, i32, i32) {
    %c0_i32 = arith.constant 0 : i32
    %c0_i32_0 = arith.constant 0 : i32
    %c0_i32_1 = arith.constant 0 : i32
    return %arg0, %c0_i32, %c0_i32_0 : i32, i32, i32
  }
}

module attributes {stable_mosaic.version = 11 : i64} {
  func.func @conv_stats_kernel(%arg0: i32, %arg1: memref<1x18x18x4xf32, #tpu.memory_space<vmem>>, %arg2: memref<9x4x128xf32, #tpu.memory_space<vmem>>, %arg3: memref<1x256x128xf32, #tpu.memory_space<vmem>>, %arg4: memref<1x8x128xf32, #tpu.memory_space<vmem>>) attributes {dimension_semantics = [#tpu.dimension_semantics<parallel>], iteration_bounds = array<i64: 2>, scalar_prefetch = 0 : i64, scratch_operands = 0 : i64, tpu.core_type = #tpu.core_type<tc>, window_params = [{transform_indices = @transform_0, window_bounds = array<i64: 1, 18, 18, 4>}, {pipeline_mode = #tpu.pipeline_mode<synchronous>, transform_indices = @transform_1, window_bounds = array<i64: 9, 4, 128>}, {transform_indices = @transform_2, window_bounds = array<i64: 1, 256, 128>}, {transform_indices = @transform_3, window_bounds = array<i64: 1, 8, 128>}]} {
    %cst = arith.constant 0.000000e+00 : f32
    %0 = vector.broadcast %cst : f32 to vector<256x128xf32>
    %c0 = arith.constant 0 : index
    %c0_0 = arith.constant 0 : index
    %c0_1 = arith.constant 0 : index
    %c0_2 = arith.constant 0 : index
    %1 = vector.load %arg1[%c0, %c0_0, %c0_1, %c0_2] : memref<1x18x18x4xf32, #tpu.memory_space<vmem>>, vector<1x16x16x4xf32>
    %2 = vector.shape_cast %1 : vector<1x16x16x4xf32> to vector<16x16x4xf32>
    %3 = vector.shape_cast %2 : vector<16x16x4xf32> to vector<256x4xf32>
    %c0_3 = arith.constant 0 : index
    %c0_4 = arith.constant 0 : index
    %c0_5 = arith.constant 0 : index
    %4 = vector.load %arg2[%c0_3, %c0_4, %c0_5] : memref<9x4x128xf32, #tpu.memory_space<vmem>>, vector<1x4x128xf32>
    %5 = vector.shape_cast %4 : vector<1x4x128xf32> to vector<4x128xf32>
    %cst_6 = arith.constant dense<0.000000e+00> : vector<256x128xf32>
    %6 = tpu.matmul %3, %5, %cst_6 {dimension_numbers = #tpu.dot_dimension_numbers<[1], [0], [0], [1], [0, 0, 1, 1], [], []>} : vector<256x4xf32>, vector<4x128xf32>, vector<256x128xf32> -> vector<256x128xf32>
    %7 = arith.addf %0, %6 : vector<256x128xf32>
    %c0_7 = arith.constant 0 : index
    %c0_8 = arith.constant 0 : index
    %c1 = arith.constant 1 : index
    %c0_9 = arith.constant 0 : index
    %8 = vector.load %arg1[%c0_7, %c0_8, %c1, %c0_9] : memref<1x18x18x4xf32, #tpu.memory_space<vmem>>, vector<1x16x16x4xf32>
    %9 = vector.shape_cast %8 : vector<1x16x16x4xf32> to vector<16x16x4xf32>
    %10 = vector.shape_cast %9 : vector<16x16x4xf32> to vector<256x4xf32>
    %c1_10 = arith.constant 1 : index
    %c0_11 = arith.constant 0 : index
    %c0_12 = arith.constant 0 : index
    %11 = vector.load %arg2[%c1_10, %c0_11, %c0_12] : memref<9x4x128xf32, #tpu.memory_space<vmem>>, vector<1x4x128xf32>
    %12 = vector.shape_cast %11 : vector<1x4x128xf32> to vector<4x128xf32>
    %cst_13 = arith.constant dense<0.000000e+00> : vector<256x128xf32>
    %13 = tpu.matmul %10, %12, %cst_13 {dimension_numbers = #tpu.dot_dimension_numbers<[1], [0], [0], [1], [0, 0, 1, 1], [], []>} : vector<256x4xf32>, vector<4x128xf32>, vector<256x128xf32> -> vector<256x128xf32>
    %14 = arith.addf %7, %13 : vector<256x128xf32>
    %c0_14 = arith.constant 0 : index
    %c0_15 = arith.constant 0 : index
    %c2 = arith.constant 2 : index
    %c0_16 = arith.constant 0 : index
    %15 = vector.load %arg1[%c0_14, %c0_15, %c2, %c0_16] : memref<1x18x18x4xf32, #tpu.memory_space<vmem>>, vector<1x16x16x4xf32>
    %16 = vector.shape_cast %15 : vector<1x16x16x4xf32> to vector<16x16x4xf32>
    %17 = vector.shape_cast %16 : vector<16x16x4xf32> to vector<256x4xf32>
    %c2_17 = arith.constant 2 : index
    %c0_18 = arith.constant 0 : index
    %c0_19 = arith.constant 0 : index
    %18 = vector.load %arg2[%c2_17, %c0_18, %c0_19] : memref<9x4x128xf32, #tpu.memory_space<vmem>>, vector<1x4x128xf32>
    %19 = vector.shape_cast %18 : vector<1x4x128xf32> to vector<4x128xf32>
    %cst_20 = arith.constant dense<0.000000e+00> : vector<256x128xf32>
    %20 = tpu.matmul %17, %19, %cst_20 {dimension_numbers = #tpu.dot_dimension_numbers<[1], [0], [0], [1], [0, 0, 1, 1], [], []>} : vector<256x4xf32>, vector<4x128xf32>, vector<256x128xf32> -> vector<256x128xf32>
    %21 = arith.addf %14, %20 : vector<256x128xf32>
    %c0_21 = arith.constant 0 : index
    %c1_22 = arith.constant 1 : index
    %c0_23 = arith.constant 0 : index
    %c0_24 = arith.constant 0 : index
    %22 = vector.load %arg1[%c0_21, %c1_22, %c0_23, %c0_24] : memref<1x18x18x4xf32, #tpu.memory_space<vmem>>, vector<1x16x16x4xf32>
    %23 = vector.shape_cast %22 : vector<1x16x16x4xf32> to vector<16x16x4xf32>
    %24 = vector.shape_cast %23 : vector<16x16x4xf32> to vector<256x4xf32>
    %c3 = arith.constant 3 : index
    %c0_25 = arith.constant 0 : index
    %c0_26 = arith.constant 0 : index
    %25 = vector.load %arg2[%c3, %c0_25, %c0_26] : memref<9x4x128xf32, #tpu.memory_space<vmem>>, vector<1x4x128xf32>
    %26 = vector.shape_cast %25 : vector<1x4x128xf32> to vector<4x128xf32>
    %cst_27 = arith.constant dense<0.000000e+00> : vector<256x128xf32>
    %27 = tpu.matmul %24, %26, %cst_27 {dimension_numbers = #tpu.dot_dimension_numbers<[1], [0], [0], [1], [0, 0, 1, 1], [], []>} : vector<256x4xf32>, vector<4x128xf32>, vector<256x128xf32> -> vector<256x128xf32>
    %28 = arith.addf %21, %27 : vector<256x128xf32>
    %c0_28 = arith.constant 0 : index
    %c1_29 = arith.constant 1 : index
    %c1_30 = arith.constant 1 : index
    %c0_31 = arith.constant 0 : index
    %29 = vector.load %arg1[%c0_28, %c1_29, %c1_30, %c0_31] : memref<1x18x18x4xf32, #tpu.memory_space<vmem>>, vector<1x16x16x4xf32>
    %30 = vector.shape_cast %29 : vector<1x16x16x4xf32> to vector<16x16x4xf32>
    %31 = vector.shape_cast %30 : vector<16x16x4xf32> to vector<256x4xf32>
    %c4 = arith.constant 4 : index
    %c0_32 = arith.constant 0 : index
    %c0_33 = arith.constant 0 : index
    %32 = vector.load %arg2[%c4, %c0_32, %c0_33] : memref<9x4x128xf32, #tpu.memory_space<vmem>>, vector<1x4x128xf32>
    %33 = vector.shape_cast %32 : vector<1x4x128xf32> to vector<4x128xf32>
    %cst_34 = arith.constant dense<0.000000e+00> : vector<256x128xf32>
    %34 = tpu.matmul %31, %33, %cst_34 {dimension_numbers = #tpu.dot_dimension_numbers<[1], [0], [0], [1], [0, 0, 1, 1], [], []>} : vector<256x4xf32>, vector<4x128xf32>, vector<256x128xf32> -> vector<256x128xf32>
    %35 = arith.addf %28, %34 : vector<256x128xf32>
    %c0_35 = arith.constant 0 : index
    %c1_36 = arith.constant 1 : index
    %c2_37 = arith.constant 2 : index
    %c0_38 = arith.constant 0 : index
    %36 = vector.load %arg1[%c0_35, %c1_36, %c2_37, %c0_38] : memref<1x18x18x4xf32, #tpu.memory_space<vmem>>, vector<1x16x16x4xf32>
    %37 = vector.shape_cast %36 : vector<1x16x16x4xf32> to vector<16x16x4xf32>
    %38 = vector.shape_cast %37 : vector<16x16x4xf32> to vector<256x4xf32>
    %c5 = arith.constant 5 : index
    %c0_39 = arith.constant 0 : index
    %c0_40 = arith.constant 0 : index
    %39 = vector.load %arg2[%c5, %c0_39, %c0_40] : memref<9x4x128xf32, #tpu.memory_space<vmem>>, vector<1x4x128xf32>
    %40 = vector.shape_cast %39 : vector<1x4x128xf32> to vector<4x128xf32>
    %cst_41 = arith.constant dense<0.000000e+00> : vector<256x128xf32>
    %41 = tpu.matmul %38, %40, %cst_41 {dimension_numbers = #tpu.dot_dimension_numbers<[1], [0], [0], [1], [0, 0, 1, 1], [], []>} : vector<256x4xf32>, vector<4x128xf32>, vector<256x128xf32> -> vector<256x128xf32>
    %42 = arith.addf %35, %41 : vector<256x128xf32>
    %c0_42 = arith.constant 0 : index
    %c2_43 = arith.constant 2 : index
    %c0_44 = arith.constant 0 : index
    %c0_45 = arith.constant 0 : index
    %43 = vector.load %arg1[%c0_42, %c2_43, %c0_44, %c0_45] : memref<1x18x18x4xf32, #tpu.memory_space<vmem>>, vector<1x16x16x4xf32>
    %44 = vector.shape_cast %43 : vector<1x16x16x4xf32> to vector<16x16x4xf32>
    %45 = vector.shape_cast %44 : vector<16x16x4xf32> to vector<256x4xf32>
    %c6 = arith.constant 6 : index
    %c0_46 = arith.constant 0 : index
    %c0_47 = arith.constant 0 : index
    %46 = vector.load %arg2[%c6, %c0_46, %c0_47] : memref<9x4x128xf32, #tpu.memory_space<vmem>>, vector<1x4x128xf32>
    %47 = vector.shape_cast %46 : vector<1x4x128xf32> to vector<4x128xf32>
    %cst_48 = arith.constant dense<0.000000e+00> : vector<256x128xf32>
    %48 = tpu.matmul %45, %47, %cst_48 {dimension_numbers = #tpu.dot_dimension_numbers<[1], [0], [0], [1], [0, 0, 1, 1], [], []>} : vector<256x4xf32>, vector<4x128xf32>, vector<256x128xf32> -> vector<256x128xf32>
    %49 = arith.addf %42, %48 : vector<256x128xf32>
    %c0_49 = arith.constant 0 : index
    %c2_50 = arith.constant 2 : index
    %c1_51 = arith.constant 1 : index
    %c0_52 = arith.constant 0 : index
    %50 = vector.load %arg1[%c0_49, %c2_50, %c1_51, %c0_52] : memref<1x18x18x4xf32, #tpu.memory_space<vmem>>, vector<1x16x16x4xf32>
    %51 = vector.shape_cast %50 : vector<1x16x16x4xf32> to vector<16x16x4xf32>
    %52 = vector.shape_cast %51 : vector<16x16x4xf32> to vector<256x4xf32>
    %c7 = arith.constant 7 : index
    %c0_53 = arith.constant 0 : index
    %c0_54 = arith.constant 0 : index
    %53 = vector.load %arg2[%c7, %c0_53, %c0_54] : memref<9x4x128xf32, #tpu.memory_space<vmem>>, vector<1x4x128xf32>
    %54 = vector.shape_cast %53 : vector<1x4x128xf32> to vector<4x128xf32>
    %cst_55 = arith.constant dense<0.000000e+00> : vector<256x128xf32>
    %55 = tpu.matmul %52, %54, %cst_55 {dimension_numbers = #tpu.dot_dimension_numbers<[1], [0], [0], [1], [0, 0, 1, 1], [], []>} : vector<256x4xf32>, vector<4x128xf32>, vector<256x128xf32> -> vector<256x128xf32>
    %56 = arith.addf %49, %55 : vector<256x128xf32>
    %c0_56 = arith.constant 0 : index
    %c2_57 = arith.constant 2 : index
    %c2_58 = arith.constant 2 : index
    %c0_59 = arith.constant 0 : index
    %57 = vector.load %arg1[%c0_56, %c2_57, %c2_58, %c0_59] : memref<1x18x18x4xf32, #tpu.memory_space<vmem>>, vector<1x16x16x4xf32>
    %58 = vector.shape_cast %57 : vector<1x16x16x4xf32> to vector<16x16x4xf32>
    %59 = vector.shape_cast %58 : vector<16x16x4xf32> to vector<256x4xf32>
    %c8 = arith.constant 8 : index
    %c0_60 = arith.constant 0 : index
    %c0_61 = arith.constant 0 : index
    %60 = vector.load %arg2[%c8, %c0_60, %c0_61] : memref<9x4x128xf32, #tpu.memory_space<vmem>>, vector<1x4x128xf32>
    %61 = vector.shape_cast %60 : vector<1x4x128xf32> to vector<4x128xf32>
    %cst_62 = arith.constant dense<0.000000e+00> : vector<256x128xf32>
    %62 = tpu.matmul %59, %61, %cst_62 {dimension_numbers = #tpu.dot_dimension_numbers<[1], [0], [0], [1], [0, 0, 1, 1], [], []>} : vector<256x4xf32>, vector<4x128xf32>, vector<256x128xf32> -> vector<256x128xf32>
    %63 = arith.addf %56, %62 : vector<256x128xf32>
    %c0_63 = arith.constant 0 : index
    %c0_64 = arith.constant 0 : index
    %c0_65 = arith.constant 0 : index
    %64 = vector.load %arg3[%c0_63, %c0_64, %c0_65] : memref<1x256x128xf32, #tpu.memory_space<vmem>>, vector<1x256x128xf32>
    %65 = vector.shape_cast %64 : vector<1x256x128xf32> to vector<256x128xf32>
    %66 = vector.shape_cast %63 : vector<256x128xf32> to vector<1x256x128xf32>
    tpu.vector_store %arg3[%c0_63, %c0_64, %c0_65], %66 {strides = array<i32>} : memref<1x256x128xf32, #tpu.memory_space<vmem>>, vector<1x256x128xf32>,
    %cst_66 = arith.constant 0.000000e+00 : f32
    %67 = vector.broadcast %cst_66 : f32 to vector<8x128xf32>
    %c0_67 = arith.constant 0 : index
    %c0_68 = arith.constant 0 : index
    %c0_69 = arith.constant 0 : index
    %68 = vector.load %arg4[%c0_67, %c0_68, %c0_69] : memref<1x8x128xf32, #tpu.memory_space<vmem>>, vector<1x8x128xf32>
    %69 = vector.shape_cast %68 : vector<1x8x128xf32> to vector<8x128xf32>
    %70 = vector.shape_cast %67 : vector<8x128xf32> to vector<1x8x128xf32>
    tpu.vector_store %arg4[%c0_67, %c0_68, %c0_69], %70 {strides = array<i32>} : memref<1x8x128xf32, #tpu.memory_space<vmem>>, vector<1x8x128xf32>,
    %cst_70 = arith.constant dense<0.000000e+00> : vector<128xf32>
    %71 = vector.multi_reduction <add>, %63, %cst_70 [0] : vector<256x128xf32> to vector<128xf32>
    %72 = vector.shape_cast %71 : vector<128xf32> to vector<1x128xf32>
    %c0_71 = arith.constant 0 : index
    %c0_72 = arith.constant 0 : index
    %c0_73 = arith.constant 0 : index
    %73 = vector.load %arg4[%c0_71, %c0_72, %c0_73] : memref<1x8x128xf32, #tpu.memory_space<vmem>>, vector<1x1x128xf32>
    %74 = vector.shape_cast %73 : vector<1x1x128xf32> to vector<1x128xf32>
    %75 = vector.shape_cast %72 : vector<1x128xf32> to vector<1x1x128xf32>
    tpu.vector_store %arg4[%c0_71, %c0_72, %c0_73], %75 {strides = array<i32>} : memref<1x8x128xf32, #tpu.memory_space<vmem>>, vector<1x1x128xf32>,
    %76 = arith.mulf %63, %63 : vector<256x128xf32>
    %cst_74 = arith.constant dense<0.000000e+00> : vector<128xf32>
    %77 = vector.multi_reduction <add>, %76, %cst_74 [0] : vector<256x128xf32> to vector<128xf32>
    %78 = vector.shape_cast %77 : vector<128xf32> to vector<1x128xf32>
    %c0_75 = arith.constant 0 : index
    %c1_76 = arith.constant 1 : index
    %c0_77 = arith.constant 0 : index
    %79 = vector.load %arg4[%c0_75, %c1_76, %c0_77] : memref<1x8x128xf32, #tpu.memory_space<vmem>>, vector<1x1x128xf32>
    %80 = vector.shape_cast %79 : vector<1x1x128xf32> to vector<1x128xf32>
    %81 = vector.shape_cast %78 : vector<1x128xf32> to vector<1x1x128xf32>
    tpu.vector_store %arg4[%c0_75, %c1_76, %c0_77], %81 {strides = array<i32>} : memref<1x8x128xf32, #tpu.memory_space<vmem>>, vector<1x1x128xf32>,
    return
  }
  func.func @transform_0(%arg0: i32) -> (i32, i32, i32, i32) {
    %c0_i32 = arith.constant 0 : i32
    %c0_i32_0 = arith.constant 0 : i32
    %c0_i32_1 = arith.constant 0 : i32
    %c0_i32_2 = arith.constant 0 : i32
    return %arg0, %c0_i32, %c0_i32_0, %c0_i32_1 : i32, i32, i32, i32
  }
  func.func @transform_1(%arg0: i32) -> (i32, i32, i32) {
    %c0_i32 = arith.constant 0 : i32
    %c0_i32_0 = arith.constant 0 : i32
    %c0_i32_1 = arith.constant 0 : i32
    %c0_i32_2 = arith.constant 0 : i32
    return %c0_i32, %c0_i32_0, %c0_i32_1 : i32, i32, i32
  }
  func.func @transform_2(%arg0: i32) -> (i32, i32, i32) {
    %c0_i32 = arith.constant 0 : i32
    %c0_i32_0 = arith.constant 0 : i32
    %c0_i32_1 = arith.constant 0 : i32
    return %arg0, %c0_i32, %c0_i32_0 : i32, i32, i32
  }
  func.func @transform_3(%arg0: i32) -> (i32, i32, i32) {
    %c0_i32 = arith.constant 0 : i32
    %c0_i32_0 = arith.constant 0 : i32
    %c0_i32_1 = arith.constant 0 : i32
    return %arg0, %c0_i32, %c0_i32_0 : i32, i32, i32
  }
}

</mosaic_0001>

<bundles_post_ra>
// kernel: conv3_bn_relu_forward.3
= control target key start
LH: loop header
LB: loop body
LE: loop exit
PB: predicated region body
PF: predicated region fallthrough
CT: control target
= control target key end

     0   :  { %s451_s12 = smov 0   ;;  %s610_s0 = inlined_call_operand.vmem [shape: f32[2,256,128], index: 0, kind: input, shape index: {}]   ;;  %s611_s1 = inlined_call_operand.vmem [shape: f32[1,128], index: 1, kind: input, shape index: {}]   ;;  %s612_s2 = inlined_call_operand.vmem [shape: f32[1,128], index: 2, kind: input, shape index: {}]   ;;  %s613_s3 = inlined_call_operand.vmem [shape: f32[2,256,128], index: 3, kind: output, shape index: {}]  }
   0x1 LB: > { %s400_s13 = sadd.s32 4294967295, %s429_s12   ;;  %p404_p0 = scmp.ge.s32.totalorder %s429_s12, 1  ;;  %s429_s12 = sphi %s451_s12, %s13_s12  }
   0x2   : > { %p137_p1 = scmp.lt.s32.totalorder %s429_s12, 3 }
   0x4   : > { %p138_p2 = pnand %p404_p0, %p137_p1 }
   0x5   : > { %p161_p3 = scmp.lt.s32.totalorder (!%p138_p2), %s400_s13, 1  ;;  %v462_v0 = vld [vmem:[%s611_s1] ss:$0 sm:$0xff] (!%p138_p2) }
   0x6   : > { %141 = sbr.rel (%p138_p2) target bundleno = 46 (0x2e), region = 32  ;;  %v472_v1 = vld [vmem:[%s612_s2] ss:$0 sm:$0xff] (!%p138_p2) }
   0xd   : > { %s615_s13 = smov (!%p161_p3, %s400_s13), 1 }
   0xe   : > { %s413_s14 = sshll.u32 %s615_s13, 8 }
   0xf   : > { %s467_s19 = scalar_lea.vmem %s610_s0, %s413_s14  ;;  %s495_s24 = scalar_lea.vmem %s613_s3, %s413_s14 }
  0x10   : > { %v171_v2 = vld [vmem:[%s467_s19] sm:$0xff]  ;;  %v172_v3 = vld [vmem:[%s467_s19 + $0x8] sm:$0xff]  ;;  %v173_v4 = vld [vmem:[%s467_s19 + $0x10] sm:$0xff] }
  0x11   : > { %v210_v5 = vmul.f32 %v462_v0, %v171_v2  ;;  %v211_v6 = vmul.f32 %v462_v0, %v172_v3  ;;  %v212_v7 = vmul.f32 %v462_v0, %v173_v4  ;;  %v174_v8 = vld [vmem:[%s467_s19 + $0x18] sm:$0xff]  ;;  %v175_v9 = vld [vmem:[%s467_s19 + $0x20] sm:$0xff]  ;;  %v176_v10 = vld [vmem:[%s467_s19 + $0x28] sm:$0xff] }
  0x12   : > { %v213_v11 = vmul.f32 %v462_v0, %v174_v8  ;;  %v214_v12 = vmul.f32 %v462_v0, %v175_v9  ;;  %v215_v13 = vmul.f32 %v462_v0, %v176_v10  ;;  %v177_v14 = vld [vmem:[%s467_s19 + $0x30] sm:$0xff]  ;;  %v178_v15 = vld [vmem:[%s467_s19 + $0x38] sm:$0xff]  ;;  %v179_v24 = vld [vmem:[%s467_s19 + $0x40] sm:$0xff] }
  0x13   : > { %v249_v16 = vadd.f32 %v472_v1, %v210_v5  ;;  %v250_v17 = vadd.f32 %v472_v1, %v211_v6  ;;  %v251_v18 = vadd.f32 %v472_v1, %v212_v7  ;;  %v216_v19 = vmul.f32 %v462_v0, %v177_v14  ;;  %v180_v25 = vld [vmem:[%s467_s19 + $0x48] sm:$0xff]  ;;  %v181_v26 = vld [vmem:[%s467_s19 + $0x50] sm:$0xff]  ;;  %v182_v31 = vld [vmem:[%s467_s19 + $0x58] sm:$0xff] }
  0x14   : > { %v252_v20 = vadd.f32 %v472_v1, %v213_v11  ;;  %v253_v21 = vadd.f32 %v472_v1, %v214_v12  ;;  %v254_v22 = vadd.f32 %v472_v1, %v215_v13  ;;  %v217_v23 = vmul.f32 %v462_v0, %v178_v15  ;;  %v183_v32 = vld [vmem:[%s467_s19 + $0x60] sm:$0xff]  ;;  %v184_v33 = vld [vmem:[%s467_s19 + $0x68] sm:$0xff]  ;;  %v185_v38 = vld [vmem:[%s467_s19 + $0x70] sm:$0xff] }
  0x15   : > { %v281_v27 = vmax.f32 %v249_v16, 0.0  ;;  %v282_v28 = vmax.f32 %v250_v17, 0.0  ;;  %v283_v29 = vmax.f32 %v251_v18, 0.0  ;;  %v255_v30 = vadd.f32 %v472_v1, %v216_v19  ;;  %v186_v43 = vld [vmem:[%s467_s19 + $0x78] sm:$0xff]  ;;  %v187_v56 = vld [vmem:[%s467_s19 + $0x80] sm:$0xff]  ;;  %v188_v57 = vld [vmem:[%s467_s19 + $0x88] sm:$0xff] }
  0x16   : > { %v284_v34 = vmax.f32 %v252_v20, 0.0  ;;  %v285_v35 = vmax.f32 %v253_v21, 0.0  ;;  %v286_v36 = vmax.f32 %v254_v22, 0.0  ;;  %v256_v37 = vadd.f32 %v472_v1, %v217_v23  ;;  %v189_v58 = vld [vmem:[%s467_s19 + $0x90] sm:$0xff]  ;;  %v190_v63 = vld [vmem:[%s467_s19 + $0x98] sm:$0xff]  ;;  %v191_v2 = vld [vmem:[%s467_s19 + $0xa0] sm:$0xff] }
  0x17   : > { %313 = vst [vmem:[%s495_s24] sm:$0xff] %v281_v27  ;;  %314 = vst [vmem:[%s495_s24 + $0x8] sm:$0xff] %v282_v28  ;;  %v287_v39 = vmax.f32 %v255_v30, 0.0  ;;  %v218_v40 = vmul.f32 %v462_v0, %v179_v24  ;;  %v219_v41 = vmul.f32 %v462_v0, %v180_v25  ;;  %v220_v42 = vmul.f32 %v462_v0, %v181_v26  ;;  %v192_v3 = vld [vmem:[%s467_s19 + $0xa8] sm:$0xff]  ;;  %v193_v8 = vld [vmem:[%s467_s19 + $0xb0] sm:$0xff] }
  0x18   : > { %315 = vst [vmem:[%s495_s24 + $0x10] sm:$0xff] %v283_v29  ;;  %316 = vst [vmem:[%s495_s24 + $0x18] sm:$0xff] %v284_v34  ;;  %v288_v44 = vmax.f32 %v256_v37, 0.0  ;;  %v221_v45 = vmul.f32 %v462_v0, %v182_v31  ;;  %v222_v46 = vmul.f32 %v462_v0, %v183_v32  ;;  %v223_v47 = vmul.f32 %v462_v0, %v184_v33  ;;  %v194_v13 = vld [vmem:[%s467_s19 + $0xb8] sm:$0xff]  ;;  %v195_v26 = vld [vmem:[%s467_s19 + $0xc0] sm:$0xff] }
  0x19   : > { %317 = vst [vmem:[%s495_s24 + $0x20] sm:$0xff] %v285_v35  ;;  %318 = vst [vmem:[%s495_s24 + $0x28] sm:$0xff] %v286_v36  ;;  %v257_v48 = vadd.f32 %v472_v1, %v218_v40  ;;  %v258_v49 = vadd.f32 %v472_v1, %v219_v41  ;;  %v259_v50 = vadd.f32 %v472_v1, %v220_v42  ;;  %v196_v27 = vld [vmem:[%s467_s19 + $0xc8] sm:$0xff]  ;;  %v197_v28 = vld [vmem:[%s467_s19 + $0xd0] sm:$0xff] }
  0x1a   : > { %319 = vst [vmem:[%s495_s24 + $0x30] sm:$0xff] %v287_v39  ;;  %v224_v51 = vmul.f32 %v462_v0, %v185_v38  ;;  %320 = vst [vmem:[%s495_s24 + $0x38] sm:$0xff] %v288_v44  ;;  %v260_v52 = vadd.f32 %v472_v1, %v221_v45  ;;  %v261_v53 = vadd.f32 %v472_v1, %v222_v46  ;;  %v198_v33 = vld [vmem:[%s467_s19 + $0xd8] sm:$0xff]  ;;  %v199_v34 = vld [vmem:[%s467_s19 + $0xe0] sm:$0xff] }
  0x1b   : > { %v262_v54 = vadd.f32 %v472_v1, %v223_v47  ;;  %v225_v55 = vmul.f32 %v462_v0, %v186_v43  ;;  %v289_v59 = vmax.f32 %v257_v48, 0.0  ;;  %v290_v60 = vmax.f32 %v258_v49, 0.0  ;;  %v200_v35 = vld [vmem:[%s467_s19 + $0xe8] sm:$0xff]  ;;  %v201_v40 = vld [vmem:[%s467_s19 + $0xf0] sm:$0xff]  ;;  %v202_v45 = vld [vmem:[%s467_s19 + $0xf8] sm:$0xff] }
  0x1c   : > { %v291_v61 = vmax.f32 %v259_v50, 0.0  ;;  %v263_v62 = vadd.f32 %v472_v1, %v224_v51  ;;  %v292_v4 = vmax.f32 %v260_v52, 0.0  ;;  %v293_v5 = vmax.f32 %v261_v53, 0.0 }
  0x1d   : > { %v294_v6 = vmax.f32 %v262_v54, 0.0  ;;  %v264_v7 = vadd.f32 %v472_v1, %v225_v55  ;;  %321 = vst [vmem:[%s495_s24 + $0x40] sm:$0xff] %v289_v59  ;;  %322 = vst [vmem:[%s495_s24 + $0x48] sm:$0xff] %v290_v60  ;;  %v226_v10 = vmul.f32 %v462_v0, %v187_v56  ;;  %v227_v11 = vmul.f32 %v462_v0, %v188_v57 }
  0x1e   : > { %323 = vst [vmem:[%s495_s24 + $0x50] sm:$0xff] %v291_v61  ;;  %v295_v9 = vmax.f32 %v263_v62, 0.0  ;;  %v228_v12 = vmul.f32 %v462_v0, %v189_v58  ;;  %324 = vst [vmem:[%s495_s24 + $0x58] sm:$0xff] %v292_v4  ;;  %v229_v15 = vmul.f32 %v462_v0, %v190_v63  ;;  %v230_v16 = vmul.f32 %v462_v0, %v191_v2 }
  0x1f   : > { %325 = vst [vmem:[%s495_s24 + $0x60] sm:$0xff] %v293_v5  ;;  %326 = vst [vmem:[%s495_s24 + $0x68] sm:$0xff] %v294_v6  ;;  %v296_v14 = vmax.f32 %v264_v7, 0.0  ;;  %v231_v17 = vmul.f32 %v462_v0, %v192_v3  ;;  %v265_v18 = vadd.f32 %v472_v1, %v226_v10  ;;  %v266_v19 = vadd.f32 %v472_v1, %v227_v11 }
  0x20   : > { %327 = vst [vmem:[%s495_s24 + $0x70] sm:$0xff] %v295_v9  ;;  %v267_v20 = vadd.f32 %v472_v1, %v228_v12  ;;  %v232_v21 = vmul.f32 %v462_v0, %v193_v8  ;;  %v268_v22 = vadd.f32 %v472_v1, %v229_v15  ;;  %v269_v23 = vadd.f32 %v472_v1, %v230_v16 }
  0x21   : > { %328 = vst [vmem:[%s495_s24 + $0x78] sm:$0xff] %v296_v14  ;;  %v270_v24 = vadd.f32 %v472_v1, %v231_v17  ;;  %v233_v25 = vmul.f32 %v462_v0, %v194_v13  ;;  %v297_v29 = vmax.f32 %v265_v18, 0.0  ;;  %v298_v30 = vmax.f32 %v266_v19, 0.0 }
  0x22   : > { %v299_v31 = vmax.f32 %v267_v20, 0.0  ;;  %v271_v32 = vadd.f32 %v472_v1, %v232_v21  ;;  %v300_v36 = vmax.f32 %v268_v22, 0.0  ;;  %v301_v37 = vmax.f32 %v269_v23, 0.0 }
  0x23   : > { %v302_v38 = vmax.f32 %v270_v24, 0.0  ;;  %v272_v39 = vadd.f32 %v472_v1, %v233_v25  ;;  %329 = vst [vmem:[%s495_s24 + $0x80] sm:$0xff] %v297_v29  ;;  %330 = vst [vmem:[%s495_s24 + $0x88] sm:$0xff] %v298_v30  ;;  %v234_v42 = vmul.f32 %v462_v0, %v195_v26  ;;  %v235_v43 = vmul.f32 %v462_v0, %v196_v27 }
  0x24   : > { %331 = vst [vmem:[%s495_s24 + $0x90] sm:$0xff] %v299_v31  ;;  %v303_v41 = vmax.f32 %v271_v32, 0.0  ;;  %v236_v44 = vmul.f32 %v462_v0, %v197_v28  ;;  %332 = vst [vmem:[%s495_s24 + $0x98] sm:$0xff] %v300_v36  ;;  %v237_v47 = vmul.f32 %v462_v0, %v198_v33  ;;  %v238_v48 = vmul.f32 %v462_v0, %v199_v34 }
  0x25   : > { %333 = vst [vmem:[%s495_s24 + $0xa0] sm:$0xff] %v301_v37  ;;  %334 = vst [vmem:[%s495_s24 + $0xa8] sm:$0xff] %v302_v38  ;;  %v304_v46 = vmax.f32 %v272_v39, 0.0  ;;  %v239_v49 = vmul.f32 %v462_v0, %v200_v35  ;;  %v273_v50 = vadd.f32 %v472_v1, %v234_v42  ;;  %v274_v51 = vadd.f32 %v472_v1, %v235_v43 }
  0x26   : > { %335 = vst [vmem:[%s495_s24 + $0xb0] sm:$0xff] %v303_v41  ;;  %v275_v52 = vadd.f32 %v472_v1, %v236_v44  ;;  %v240_v53 = vmul.f32 %v462_v0, %v201_v40  ;;  %v276_v54 = vadd.f32 %v472_v1, %v237_v47  ;;  %v277_v55 = vadd.f32 %v472_v1, %v238_v48 }
  0x27   : > { %336 = vst [vmem:[%s495_s24 + $0xb8] sm:$0xff] %v304_v46  ;;  %v278_v56 = vadd.f32 %v472_v1, %v239_v49  ;;  %v241_v57 = vmul.f32 %v462_v0, %v202_v45  ;;  %v305_v58 = vmax.f32 %v273_v50, 0.0  ;;  %v306_v59 = vmax.f32 %v274_v51, 0.0 }
  0x28   : > { %v307_v60 = vmax.f32 %v275_v52, 0.0  ;;  %v279_v61 = vadd.f32 %v472_v1, %v240_v53  ;;  %v308_v62 = vmax.f32 %v276_v54, 0.0  ;;  %v309_v63 = vmax.f32 %v277_v55, 0.0 }
  0x29   : > { %v310_v2 = vmax.f32 %v278_v56, 0.0  ;;  %v280_v3 = vadd.f32 %v472_v1, %v241_v57  ;;  %337 = vst [vmem:[%s495_s24 + $0xc0] sm:$0xff] %v305_v58  ;;  %338 = vst [vmem:[%s495_s24 + $0xc8] sm:$0xff] %v306_v59 }
  0x2a   : > { %339 = vst [vmem:[%s495_s24 + $0xd0] sm:$0xff] %v307_v60  ;;  %v311_v4 = vmax.f32 %v279_v61, 0.0  ;;  %340 = vst [vmem:[%s495_s24 + $0xd8] sm:$0xff] %v308_v62 }
  0x2b   : > { %341 = vst [vmem:[%s495_s24 + $0xe0] sm:$0xff] %v309_v63  ;;  %342 = vst [vmem:[%s495_s24 + $0xe8] sm:$0xff] %v310_v2  ;;  %v312_v0 = vmax.f32 %v280_v3, 0.0 }
  0x2c   : > { %343 = vst [vmem:[%s495_s24 + $0xf0] sm:$0xff] %v311_v4 }
  0x2d   : > { %344 = vst [vmem:[%s495_s24 + $0xf8] sm:$0xff] %v312_v0 }
  0x2e PF: > { %s13_s12 = sadd.s32 1, %s429_s12  }
  0x2f   : > { %p10_p4 = scmp.ge.s32.totalorder %s13_s12, 4  }
  0x31   :  { %12 = sbr.rel (!%p10_p4) target bundleno = 1 (0x1), region = 62 }

// kernel: conv3_bn_relu_forward.2
= control target key start
LH: loop header
LB: loop body
LE: loop exit
PB: predicated region body
PF: predicated region fallthrough
CT: control target
= control target key end

     0   :  { %s5411_s12 = smov 0   ;;  %s6420_s0 = inlined_call_operand.vmem [shape: f32[2,18,18,4], index: 0, kind: input, shape index: {}]   ;;  %s6421_s1 = inlined_call_operand.vmem [shape: f32[9,4,128], index: 1, kind: input, shape index: {}]   ;;  %s6422_s2 = inlined_call_operand.vmem [shape: f32[2,256,128], index: 2, kind: output, shape index: {0}]   ;;  %s6423_s3 = inlined_call_operand.vmem [shape: f32[2,8,128], index: 3, kind: output, shape index: {1}]  }
   0x1 LB: > { %s3858_s13 = sadd.s32 4294967295, %s5388_s12   ;;  %p3862_p0 = scmp.ge.s32.totalorder %s5388_s12, 1  ;;  %s5388_s12 = sphi %s5411_s12, %s14_s12  }
   0x2   : > { %p140_p1 = scmp.lt.s32.totalorder %s5388_s12, 3 }
   0x4   : > { %p141_p2 = pnand %p3862_p0, %p140_p1 }
   0x6   : > { %144 = sbr.rel (%p141_p2) target bundleno = 539 (0x21b), region = 28 }
   0xd   : > { %v3867_v0 = vld [vmem:[%s6421_s1 + $0x4] sm:$0xf]  ;;  %vm346_vm0 = vcmask 1043456   ;;  %v5425_v1 = vld [vmem:[%s6421_s1 + $0x10] sm:$0xf]  ;;  %p168_p3 = scmp.lt.s32.totalorder %s3858_s13, 1 }
   0xe   : > { %4664 = vmatprep.subr.msk.mxu1 %vm346_vm0, %v3867_v0  ;;  %4864 = vmatprep.subr.msk.mxu0 %vm346_vm0, %v5425_v1  ;;  %v214_v2 = vld [vmem:[%s6421_s1] sm:$0xf]  ;;  %v4132_v3 = vld [vmem:[%s6421_s1 + $0x14] sm:$0xf]  ;;  %vm249_vm1 = vcmask 31744  }
   0xf   : > { %4665 = vmatpush3.msk.msra.mxu1 %vm346_vm0, %v3867_v0  ;;  %4865 = vmatpush3.msk.msra.mxu0 %vm346_vm0, %v5425_v1  ;;  %s6534_s13 = smov (!%p168_p3, %s3858_s13), 1  ;;  %v4198_v9 = vld [vmem:[%s6421_s1 + $0x18] sm:$0xf]  ;;  %v5466_v10 = vld [vmem:[%s6421_s1 + $0x8] sm:$0xf] }
  0x10   : > { %4714 = vmatprep.subr.msk.mxu1 %vm346_vm0, %v214_v2  ;;  %4914 = vmatprep.subr.msk.mxu0 %vm346_vm0, %v4132_v3  ;;  %s5372_s22 = smul.u32 432, %s6534_s13  ;;  %v5585_v28 = vld [vmem:[%s6421_s1 + $0x1c] sm:$0xf]  ;;  %v5748_v61 = vld [vmem:[%s6421_s1 + $0xc] sm:$0xf]  ;;  %s3866_s9 = sshll.u32 %s6534_s13, 3 }
  0x11   : > { %s6356_s14 = scalar_lea.vmem %s6423_s3, %s3866_s9  ;;  %s4366_s15 = sshll.u32 %s6534_s13, 8 }
  0x12   : > { %s5447_s25 = scalar_lea.vmem %s6420_s0, %s5372_s22  ;;  %s6375_s18 = scalar_lea.vmem %s6422_s2, %s4366_s15 }
  0x13   : > { %v215_v4 = vld [vmem:[%s5447_s25 + $0x1] sm:$0xff]  ;;  %v4034_v5 = vld [vmem:[%s5447_s25 + $0x19] sm:$0xff]  ;;  %v216_v6 = vld [vmem:[%s5447_s25 + $0x9] sm:$0xff] }
  0x14   : > { %4666 = vmatprep.mubr.msk.f32.mxu1 %vm249_vm1, %v215_v4  ;;  %4866 = vmatprep.mubr.msk.f32.mxu0 %vm249_vm1, %v4034_v5  ;;  %v4035_v7 = vld [vmem:[%s5447_s25 + $0x21] sm:$0xff]  ;;  %v5456_v8 = vld [vmem:[%s5447_s25 + $0x31] sm:$0xff]  ;;  %v5471_v11 = vld [vmem:[%s5447_s25 + $0x39] sm:$0xff] }
  0x15   : > { %4667 = vmatmul.mubr.msk.f32.vlgmr.msra.gmra.mrb[0].mxu1 %vm249_vm1, %v216_v6  ;;  %4867 = vmatmul.mubr.msk.f32.vlgmr.msra.gmra.mrb[0].mxu0 %vm249_vm1, %v4035_v7  ;;  %v5477_v12 = vld [vmem:[%s5447_s25 + $0x49] sm:$0xff]  ;;  %v5490_v13 = vld [vmem:[%s5447_s25 + $0x51] sm:$0xff]  ;;  %v5493_v14 = vld [vmem:[%s5447_s25 + $0x61] sm:$0xff] }
  0x16   : > { %4715 = vmatpush3.msk.msra.mxu1 %vm346_vm0, %v214_v2  ;;  %4915 = vmatpush3.msk.msra.mxu0 %vm346_vm0, %v4132_v3  ;;  %v5504_v15 = vld [vmem:[%s5447_s25 + $0x69] sm:$0xff]  ;;  %v5507_v16 = vld [vmem:[%s5447_s25 + $0x79] sm:$0xff]  ;;  %v5518_v17 = vld [vmem:[%s5447_s25 + $0x81] sm:$0xff] }
  0x17   : > { %4669 = vmatprep.mubr.msk.f32.mxu1 %vm249_vm1, %v4034_v5  ;;  %4869 = vmatprep.mubr.msk.f32.mxu0 %vm249_vm1, %v5456_v8  ;;  %v5521_v18 = vld [vmem:[%s5447_s25 + $0x91] sm:$0xff]  ;;  %v5532_v19 = vld [vmem:[%s5447_s25 + $0x99] sm:$0xff]  ;;  %v5535_v20 = vld [vmem:[%s5447_s25 + $0xa9] sm:$0xff] }
  0x18   : > { %4964 = vmatprep.subr.msk.mxu0 %vm346_vm0, %v4198_v9  ;;  %4764 = vmatprep.subr.msk.mxu1 %vm346_vm0, %v5466_v10  ;;  %v5546_v21 = vld [vmem:[%s5447_s25 + $0xb1] sm:$0xff]  ;;  %v5549_v22 = vld [vmem:[%s5447_s25 + $0xc1] sm:$0xff]  ;;  %v5560_v23 = vld [vmem:[%s5447_s25 + $0xc9] sm:$0xff] }
  0x19   : > { %4670 = vmatmul.mubr.msk.f32.gmra.mrb[2].mxu1 %vm249_vm1, %v4035_v7  ;;  %4870 = vmatmul.mubr.msk.f32.gmra.mrb[2].mxu0 %vm249_vm1, %v5471_v11  ;;  %v5563_v24 = vld [vmem:[%s5447_s25 + $0x1a] sm:$0xff]  ;;  %v5574_v25 = vld [vmem:[%s5447_s25 + $0x22] sm:$0xff]  ;;  %v5580_v27 = vld [vmem:[%s5447_s25 + $0x32] sm:$0xff] }
  0x1a   : > { %4672 = vmatprep.mubr.msk.f32.mxu1 %vm249_vm1, %v5456_v8  ;;  %4872 = vmatprep.mubr.msk.f32.mxu0 %vm249_vm1, %v5477_v12  ;;  %v5577_v26 = vld [vmem:[%s5447_s25 + $0xd9] sm:$0xff]  ;;  %v5595_v29 = vld [vmem:[%s5447_s25 + $0xe1] sm:$0xff]  ;;  %v5603_v31 = vld [vmem:[%s5447_s25 + $0xf1] sm:$0xff] }
  0x1b   : > { %6469 = vst [vmem:[#allocation2_spill] sm:$0xff] %v5595_v29  ;;  %v5598_v30 = vld [vmem:[%s5447_s25 + $0x3a] sm:$0xff]  ;;  %6470 = vst [vmem:[#allocation3_spill] sm:$0xff] %v5603_v31  ;;  %v5606_v32 = vld [vmem:[%s5447_s25 + $0x4a] sm:$0xff] }
  0x1c   : > { %v5619_v33 = vld [vmem:[%s5447_s25 + $0xf9] sm:$0xff]  ;;  %v5625_v35 = vld [vmem:[%s5447_s25 + $0x109] sm:$0xff]  ;;  %v5639_v37 = vld [vmem:[%s5447_s25 + $0x111] sm:$0xff] }
  0x1d   : > { %4673 = vmatmul.mubr.msk.f32.gmra.mrb[4].mxu1 %vm249_vm1, %v5471_v11  ;;  %4873 = vmatmul.mubr.msk.f32.gmra.mrb[4].mxu0 %vm249_vm1, %v5490_v13  ;;  %6471 = vst [vmem:[#allocation4_spill] sm:$0xff] %v5619_v33  ;;  %v5622_v34 = vld [vmem:[%s5447_s25 + $0x52] sm:$0xff]  ;;  %6472 = vst [vmem:[#allocation5_spill] sm:$0xff] %v5625_v35  ;;  %v5628_v36 = vld [vmem:[%s5447_s25 + $0x62] sm:$0xff] }
  0x1e   : > { %4675 = vmatprep.mubr.msk.f32.mxu1 %vm249_vm1, %v5477_v12  ;;  %4875 = vmatprep.mubr.msk.f32.mxu0 %vm249_vm1, %v5493_v14  ;;  %6473 = vst [vmem:[#allocation6_spill] sm:$0xff] %v5639_v37  ;;  %v5642_v38 = vld [vmem:[%s5447_s25 + $0x6a] sm:$0xff]  ;;  %v5645_v39 = vld [vmem:[%s5447_s25 + $0x121] sm:$0xff]  ;;  %v5665_v43 = vld [vmem:[%s5447_s25 + $0x139] sm:$0xff] }
  0x1f   : > { %6474 = vst [vmem:[#allocation7_spill] sm:$0xff] %v5645_v39  ;;  %v5648_v40 = vld [vmem:[%s5447_s25 + $0x7a] sm:$0xff]  ;;  %v5659_v41 = vld [vmem:[%s5447_s25 + $0x129] sm:$0xff]  ;;  %6476 = vst [vmem:[#allocation9_spill] sm:$0xff] %v5665_v43 }
  0x20   : > { %6475 = vst [vmem:[#allocation8_spill] sm:$0xff] %v5659_v41  ;;  %v5662_v42 = vld [vmem:[%s5447_s25 + $0x82] sm:$0xff]  ;;  %v5668_v44 = vld [vmem:[%s5447_s25 + $0x92] sm:$0xff]  ;;  %v5682_v46 = vld [vmem:[%s5447_s25 + $0x9a] sm:$0xff] }
  0x21   : > { %4676 = vmatmul.mubr.msk.f32.gmra.mrb[6].mxu1 %vm249_vm1, %v5490_v13  ;;  %4876 = vmatmul.mubr.msk.f32.gmra.mrb[6].mxu0 %vm249_vm1, %v5504_v15  ;;  %v5679_v45 = vld [vmem:[%s5447_s25 + $0x141] sm:$0xff]  ;;  %v5685_v47 = vld [vmem:[%s5447_s25 + $0x151] sm:$0xff]  ;;  %v5699_v49 = vld [vmem:[%s5447_s25 + $0x159] sm:$0xff] }
  0x22   : > { %4678 = vmatprep.mubr.msk.f32.mxu1 %vm249_vm1, %v5493_v14  ;;  %4878 = vmatprep.mubr.msk.f32.mxu0 %vm249_vm1, %v5507_v16  ;;  %6477 = vst [vmem:[#allocation10_spill] sm:$0xff] %v5679_v45  ;;  %6478 = vst [vmem:[#allocation11_spill] sm:$0xff] %v5685_v47  ;;  %v5688_v48 = vld [vmem:[%s5447_s25 + $0xaa] sm:$0xff]  ;;  %v5702_v50 = vld [vmem:[%s5447_s25 + $0xb2] sm:$0xff] }
  0x23   : > { %6479 = vst [vmem:[#allocation12_spill] sm:$0xff] %v5699_v49  ;;  %v5705_v51 = vld [vmem:[%s5447_s25 + $0x169] sm:$0xff]  ;;  %v5719_v53 = vld [vmem:[%s5447_s25 + $0x171] sm:$0xff]  ;;  %v182_v55 = vld [vmem:[%s5447_s25] sm:$0xff] }
  0x24   : > { %6480 = vst [vmem:[#allocation13_spill] sm:$0xff] %v5705_v51  ;;  %v5708_v52 = vld [vmem:[%s5447_s25 + $0xc2] sm:$0xff]  ;;  %6481 = vst [vmem:[#allocation14_spill] sm:$0xff] %v5719_v53  ;;  %v5722_v54 = vld [vmem:[%s5447_s25 + $0xca] sm:$0xff] }
  0x25   : > { %4679 = vmatmul.mubr.msk.f32.gmra.mrb[8].mxu1 %vm249_vm1, %v5504_v15  ;;  %4879 = vmatmul.mubr.msk.f32.gmra.mrb[8].mxu0 %vm249_vm1, %v5518_v17  ;;  %v5726_v56 = vld [vmem:[%s5447_s25 + $0xda] sm:$0xff]  ;;  %v183_v57 = vld [vmem:[%s5447_s25 + $0x8] sm:$0xff]  ;;  %v5743_v60 = vld [vmem:[%s5447_s25 + $0xf2] sm:$0xff] }
  0x26   : > { %4681 = vmatprep.mubr.msk.f32.mxu1 %vm249_vm1, %v5507_v16  ;;  %4881 = vmatprep.mubr.msk.f32.mxu0 %vm249_vm1, %v5521_v18  ;;  %v5737_v58 = vld [vmem:[%s5447_s25 + $0xe2] sm:$0xff]  ;;  %v5740_v59 = vld [vmem:[%s5447_s25 + $0x18] sm:$0xff]  ;;  %v5766_v0 = vld [vmem:[%s5447_s25 + $0x30] sm:$0xff] }
  0x27   : > { %6482 = vst [vmem:[#allocation15_spill] sm:$0xff] %v5740_v59  ;;  %v5758_v62 = vld [vmem:[%s5447_s25 + $0x20] sm:$0xff]  ;;  %6484 = vst [vmem:[#allocation17_spill] sm:$0xff] %v5766_v0  ;;  %v5769_v2 = vld [vmem:[%s5447_s25 + $0x10a] sm:$0xff] }
  0x28   : > { %6483 = vst [vmem:[#allocation16_spill] sm:$0xff] %v5758_v62  ;;  %v5761_v63 = vld [vmem:[%s5447_s25 + $0xfa] sm:$0xff]  ;;  %v5785_v4 = vld [vmem:[%s5447_s25 + $0x112] sm:$0xff]  ;;  %v5788_v5 = vld [vmem:[%s5447_s25 + $0x48] sm:$0xff] }
  0x29   : > { %4682 = vmatmul.mubr.msk.f32.gmra.mrb[10].mxu1 %vm249_vm1, %v5518_v17  ;;  %4882 = vmatmul.mubr.msk.f32.gmra.mrb[10].mxu0 %vm249_vm1, %v5532_v19  ;;  %v5782_v3 = vld [vmem:[%s5447_s25 + $0x38] sm:$0xff]  ;;  %6486 = vst [vmem:[#allocation19_spill] sm:$0xff] %v5788_v5  ;;  %v5791_v6 = vld [vmem:[%s5447_s25 + $0x122] sm:$0xff]  ;;  %v5802_v7 = vld [vmem:[%s5447_s25 + $0x50] sm:$0xff] }
  0x2a   : > { %4684 = vmatprep.mubr.msk.f32.mxu1 %vm249_vm1, %v5521_v18  ;;  %4884 = vmatprep.mubr.msk.f32.mxu0 %vm249_vm1, %v5535_v20  ;;  %6485 = vst [vmem:[#allocation18_spill] sm:$0xff] %v5782_v3  ;;  %6487 = vst [vmem:[#allocation20_spill] sm:$0xff] %v5802_v7 }
  0x2d   : > { %4685 = vmatmul.mubr.msk.f32.gmra.mrb[12].mxu1 %vm249_vm1, %v5532_v19  ;;  %4885 = vmatmul.mubr.msk.f32.gmra.mrb[12].mxu0 %vm249_vm1, %v5546_v21 }
  0x2e   : > { %4687 = vmatprep.mubr.msk.f32.mxu1 %vm249_vm1, %v5535_v20  ;;  %4887 = vmatprep.mubr.msk.f32.mxu0 %vm249_vm1, %v5549_v22 }
  0x31   : > { %4688 = vmatmul.mubr.msk.f32.gmra.mrb[14].mxu1 %vm249_vm1, %v5546_v21  ;;  %4888 = vmatmul.mubr.msk.f32.gmra.mrb[14].mxu0 %vm249_vm1, %v5560_v23 }
  0x32   : > { %4690 = vmatprep.mubr.msk.f32.mxu1 %vm249_vm1, %v5549_v22  ;;  %4916 = vmatprep.mubr.msk.f32.mxu0 %vm249_vm1, %v5563_v24 }
  0x35   : > { %4691 = vmatmul.mubr.msk.f32.gmra.mrb[16].mxu1 %vm249_vm1, %v5560_v23  ;;  %4917 = vmatmul.mubr.msk.f32.vlgmr.msra.gmra.mrb[0].mxu0 %vm249_vm1, %v5574_v25 }
  0x36   : > { %4965 = vmatpush3.msk.msra.mxu0 %vm346_vm0, %v4198_v9  ;;  %4693 = vmatprep.mubr.msk.f32.mxu1 %vm249_vm1, %v5577_v26  ;;  %v5805_v9 = vld [vmem:[%s5447_s25 + $0x12a] sm:$0xff] }
  0x37   : > { %4919 = vmatprep.mubr.msk.f32.mxu0 %vm249_vm1, %v5580_v27  ;;  %5014 = vmatprep.subr.msk.mxu0 %vm346_vm0, %v5585_v28 }
  0x39   : > { %4694 = vmatmul.mubr.msk.f32.gmra.mrb[18].mxu1 %vm249_vm1, %v5595_v29  ;;  %4920 = vmatmul.mubr.msk.f32.gmra.mrb[2].mxu0 %vm249_vm1, %v5598_v30  ;;  %v5902_v29 = vld [vmem:[%s5447_s25 + $0xd8] sm:$0xff] }
  0x3a   : > { %4696 = vmatprep.mubr.msk.f32.mxu1 %vm249_vm1, %v5603_v31  ;;  %4922 = vmatprep.mubr.msk.f32.mxu0 %vm249_vm1, %v5606_v32  ;;  %v5885_v31 = vld [vmem:[%s5447_s25 + $0x18a] sm:$0xff] }
  0x3b   : > { %6498 = vst [vmem:[#allocation31_spill] sm:$0xff] %v5885_v31 }
  0x3d   : > { %4697 = vmatmul.mubr.msk.f32.gmra.mrb[20].mxu1 %vm249_vm1, %v5619_v33  ;;  %4923 = vmatmul.mubr.msk.f32.gmra.mrb[4].mxu0 %vm249_vm1, %v5622_v34  ;;  %v5871_v33 = vld [vmem:[%s5447_s25 + $0x182] sm:$0xff] }
  0x3e   : > { %4699 = vmatprep.mubr.msk.f32.mxu1 %vm249_vm1, %v5625_v35  ;;  %4925 = vmatprep.mubr.msk.f32.mxu0 %vm249_vm1, %v5628_v36  ;;  %v5868_v35 = vld [vmem:[%s5447_s25 + $0xa8] sm:$0xff]  ;;  %6496 = vst [vmem:[#allocation29_spill] sm:$0xff] %v5871_v33 }
  0x3f   : > { %6495 = vst [vmem:[#allocation28_spill] sm:$0xff] %v5868_v35 }
  0x41   : > { %4700 = vmatmul.mubr.msk.f32.gmra.mrb[22].mxu1 %vm249_vm1, %v5639_v37  ;;  %4926 = vmatmul.mubr.msk.f32.gmra.mrb[6].mxu0 %vm249_vm1, %v5642_v38  ;;  %v5865_v37 = vld [vmem:[%s5447_s25 + $0x172] sm:$0xff] }
  0x42   : > { %4702 = vmatprep.mubr.msk.f32.mxu1 %vm249_vm1, %v5645_v39  ;;  %4928 = vmatprep.mubr.msk.f32.mxu0 %vm249_vm1, %v5648_v40  ;;  %v5862_v39 = vld [vmem:[%s5447_s25 + $0x98] sm:$0xff]  ;;  %6494 = vst [vmem:[#allocation27_spill] sm:$0xff] %v5865_v37 }
  0x43   : > { %6493 = vst [vmem:[#allocation26_spill] sm:$0xff] %v5862_v39 }
  0x45   : > { %4703 = vmatmul.mubr.msk.f32.gmra.mrb[24].mxu1 %vm249_vm1, %v5659_v41  ;;  %4929 = vmatmul.mubr.msk.f32.gmra.mrb[8].mxu0 %vm249_vm1, %v5662_v42  ;;  %v5851_v41 = vld [vmem:[%s5447_s25 + $0x16a] sm:$0xff] }
  0x46   : > { %4705 = vmatprep.mubr.msk.f32.mxu1 %vm249_vm1, %v5665_v43  ;;  %4931 = vmatprep.mubr.msk.f32.mxu0 %vm249_vm1, %v5668_v44  ;;  %v5848_v43 = vld [vmem:[%s5447_s25 + $0x90] sm:$0xff] }
  0x47   : > { %6492 = vst [vmem:[#allocation25_spill] sm:$0xff] %v5848_v43 }
  0x49   : > { %4706 = vmatmul.mubr.msk.f32.gmra.mrb[26].mxu1 %vm249_vm1, %v5679_v45  ;;  %4932 = vmatmul.mubr.msk.f32.gmra.mrb[10].mxu0 %vm249_vm1, %v5682_v46  ;;  %v5845_v45 = vld [vmem:[%s5447_s25 + $0x15a] sm:$0xff] }
  0x4a   : > { %4708 = vmatprep.mubr.msk.f32.mxu1 %vm249_vm1, %v5685_v47  ;;  %4934 = vmatprep.mubr.msk.f32.mxu0 %vm249_vm1, %v5688_v48  ;;  %v5842_v47 = vld [vmem:[%s5447_s25 + $0x80] sm:$0xff] }
  0x4b   : > { %6491 = vst [vmem:[#allocation24_spill] sm:$0xff] %v5842_v47 }
  0x4d   : > { %4709 = vmatmul.mubr.msk.f32.gmra.mrb[28].mxu1 %vm249_vm1, %v5699_v49  ;;  %4935 = vmatmul.mubr.msk.f32.gmra.mrb[12].mxu0 %vm249_vm1, %v5702_v50  ;;  %v5831_v49 = vld [vmem:[%s5447_s25 + $0x152] sm:$0xff] }
  0x4e   : > { %4711 = vmatprep.mubr.msk.f32.mxu1 %vm249_vm1, %v5705_v51  ;;  %4937 = vmatprep.mubr.msk.f32.mxu0 %vm249_vm1, %v5708_v52  ;;  %v5828_v51 = vld [vmem:[%s5447_s25 + $0x78] sm:$0xff] }
  0x4f   : > { %6490 = vst [vmem:[#allocation23_spill] sm:$0xff] %v5828_v51 }
  0x51   : > { %4712 = vmatmul.mubr.msk.f32.gmra.mrb[30].mxu1 %vm249_vm1, %v5719_v53  ;;  %4938 = vmatmul.mubr.msk.f32.gmra.mrb[14].mxu0 %vm249_vm1, %v5722_v54  ;;  %v5825_v53 = vld [vmem:[%s5447_s25 + $0x142] sm:$0xff] }
  0x52   : > { %4716 = vmatprep.mubr.msk.f32.mxu1 %vm249_vm1, %v182_v55  ;;  %4940 = vmatprep.mubr.msk.f32.mxu0 %vm249_vm1, %v5726_v56  ;;  %v5811_v55 = vld [vmem:[%s5447_s25 + $0x13a] sm:$0xff] }
  0x55   : > { %4717 = vmatmul.mubr.msk.f32.vlgmr.msra.gmra.mrb[0].mxu1 %vm249_vm1, %v183_v57  ;;  %4941 = vmatmul.mubr.msk.f32.gmra.mrb[16].mxu0 %vm249_vm1, %v5737_v58  ;;  %v5822_v57 = vld [vmem:[%s5447_s25 + $0x68] sm:$0xff] }
  0x56   : > { %4765 = vmatpush3.msk.msra.mxu1 %vm346_vm0, %v5466_v10  ;;  %4719 = vmatprep.mubr.msk.f32.mxu1 %vm249_vm1, %v5740_v59  ;;  %v5808_v10 = vld [vmem:[%s5447_s25 + $0x60] sm:$0xff]  ;;  %6489 = vst [vmem:[#allocation22_spill] sm:$0xff] %v5822_v57 }
  0x57   : > { %4943 = vmatprep.mubr.msk.f32.mxu0 %vm249_vm1, %v5743_v60  ;;  %4814 = vmatprep.subr.msk.mxu1 %vm346_vm0, %v5748_v61  ;;  %6488 = vst [vmem:[#allocation21_spill] sm:$0xff] %v5808_v10  ;;  %v5888_v59 = vld [vmem:[%s5447_s25 + $0xc0] sm:$0xff] }
  0x59   : > { %4720 = vmatmul.mubr.msk.f32.gmra.mrb[2].mxu1 %vm249_vm1, %v5758_v62  ;;  %4944 = vmatmul.mubr.msk.f32.gmra.mrb[18].mxu0 %vm249_vm1, %v5761_v63  ;;  %v5882_v62 = vld [vmem:[%s5447_s25 + $0xb0] sm:$0xff] }
  0x5a   : > { %4722 = vmatprep.mubr.msk.f32.mxu1 %vm249_vm1, %v5766_v0  ;;  %4946 = vmatprep.mubr.msk.f32.mxu0 %vm249_vm1, %v5769_v2  ;;  %6497 = vst [vmem:[#allocation30_spill] sm:$0xff] %v5882_v62 }
  0x5d   : > { %4723 = vmatmul.mubr.msk.f32.gmra.mrb[4].mxu1 %vm249_vm1, %v5782_v3  ;;  %4947 = vmatmul.mubr.msk.f32.gmra.mrb[20].mxu0 %vm249_vm1, %v5785_v4 }
  0x5e   : > { %4725 = vmatprep.mubr.msk.f32.mxu1 %vm249_vm1, %v5788_v5  ;;  %4949 = vmatprep.mubr.msk.f32.mxu0 %vm249_vm1, %v5791_v6 }
  0x61   : > { %4726 = vmatmul.mubr.msk.f32.gmra.mrb[6].mxu1 %vm249_vm1, %v5802_v7  ;;  %4950 = vmatmul.mubr.msk.f32.gmra.mrb[22].mxu0 %vm249_vm1, %v5805_v9 }
  0x62   : > { %4728 = vmatprep.mubr.msk.f32.mxu1 %vm249_vm1, %v5808_v10  ;;  %4952 = vmatprep.mubr.msk.f32.mxu0 %vm249_vm1, %v5811_v55 }
  0x65   : > { %4729 = vmatmul.mubr.msk.f32.gmra.mrb[8].mxu1 %vm249_vm1, %v5822_v57  ;;  %4953 = vmatmul.mubr.msk.f32.gmra.mrb[24].mxu0 %vm249_vm1, %v5825_v53 }
  0x66   : > { %4731 = vmatprep.mubr.msk.f32.mxu1 %vm249_vm1, %v5828_v51  ;;  %4955 = vmatprep.mubr.msk.f32.mxu0 %vm249_vm1, %v5831_v49 }
  0x69   : > { %4732 = vmatmul.mubr.msk.f32.gmra.mrb[10].mxu1 %vm249_vm1, %v5842_v47  ;;  %4956 = vmatmul.mubr.msk.f32.gmra.mrb[26].mxu0 %vm249_vm1, %v5845_v45 }
  0x6a   : > { %4734 = vmatprep.mubr.msk.f32.mxu1 %vm249_vm1, %v5848_v43  ;;  %4958 = vmatprep.mubr.msk.f32.mxu0 %vm249_vm1, %v5851_v41 }
  0x6d   : > { %4735 = vmatmul.mubr.msk.f32.gmra.mrb[12].mxu1 %vm249_vm1, %v5862_v39  ;;  %4959 = vmatmul.mubr.msk.f32.gmra.mrb[28].mxu0 %vm249_vm1, %v5865_v37  ;;  %v5907_v37 = vld [vmem:[%s6421_s1 + $0x20] sm:$0xf] }
  0x6e   : > { %4737 = vmatprep.mubr.msk.f32.mxu1 %vm249_vm1, %v5868_v35  ;;  %4961 = vmatprep.mubr.msk.f32.mxu0 %vm249_vm1, %v5871_v33  ;;  %v5899_v33 = vld [vmem:[%s5447_s25 + $0xc8] sm:$0xff] }
  0x6f   : > { %6499 = vst [vmem:[#allocation32_spill] sm:$0xff] %v5899_v33 }
  0x71   : > { %4738 = vmatmul.mubr.msk.f32.gmra.mrb[14].mxu1 %vm249_vm1, %v5882_v62  ;;  %4962 = vmatmul.mubr.msk.f32.gmra.mrb[30].mxu0 %vm249_vm1, %v5885_v31  ;;  %v5918_v31 = vld [vmem:[%s5447_s25 + $0xe0] sm:$0xff] }
  0x72   : > { %4740 = vmatprep.mubr.msk.f32.mxu1 %vm249_vm1, %v5888_v59  ;;  %4966 = vmatprep.mubr.msk.f32.mxu0 %vm249_vm1, %v5766_v0  ;;  %v5923_v0 = vld [vmem:[%s5447_s25 + $0xf0] sm:$0xff] }
  0x75   : > { %4741 = vmatmul.mubr.msk.f32.gmra.mrb[16].mxu1 %vm249_vm1, %v5899_v33  ;;  %4967 = vmatmul.mubr.msk.f32.vlgmr.msra.gmra.mrb[0].mxu0 %vm249_vm1, %v5782_v3  ;;  %v899_v3 = vld [vmem:[%s5447_s25 + $0x2] sm:$0xff] }
  0x76   : > { %5015 = vmatpush3.msk.msra.mxu0 %vm346_vm0, %v5585_v28  ;;  %4743 = vmatprep.mubr.msk.f32.mxu1 %vm249_vm1, %v5902_v29  ;;  %v5936_v28 = vld [vmem:[%s5447_s25 + $0xf8] sm:$0xff] }
  0x77   : > { %4969 = vmatprep.mubr.msk.f32.mxu0 %vm249_vm1, %v5788_v5  ;;  %5064 = vmatprep.subr.msk.mxu0 %vm346_vm0, %v5907_v37  ;;  %v5939_v5 = vld [vmem:[%s5447_s25 + $0x108] sm:$0xff] }
  0x79   : > { %4744 = vmatmul.mubr.msk.f32.gmra.mrb[18].mxu1 %vm249_vm1, %v5918_v31  ;;  %4970 = vmatmul.mubr.msk.f32.gmra.mrb[2].mxu0 %vm249_vm1, %v5802_v7  ;;  %v5950_v7 = vld [vmem:[%s5447_s25 + $0x110] sm:$0xff] }
  0x7a   : > { %4746 = vmatprep.mubr.msk.f32.mxu1 %vm249_vm1, %v5923_v0  ;;  %4972 = vmatprep.mubr.msk.f32.mxu0 %vm249_vm1, %v5808_v10  ;;  %v5953_v10 = vld [vmem:[%s5447_s25 + $0x120] sm:$0xff] }
  0x7d   : > { %4747 = vmatmul.mubr.msk.f32.gmra.mrb[20].mxu1 %vm249_vm1, %v5936_v28  ;;  %4973 = vmatmul.mubr.msk.f32.gmra.mrb[4].mxu0 %vm249_vm1, %v5822_v57  ;;  %v5964_v57 = vld [vmem:[%s5447_s25 + $0x128] sm:$0xff] }
  0x7e   : > { %4749 = vmatprep.mubr.msk.f32.mxu1 %vm249_vm1, %v5939_v5  ;;  %4975 = vmatprep.mubr.msk.f32.mxu0 %vm249_vm1, %v5828_v51  ;;  %v5967_v51 = vld [vmem:[%s5447_s25 + $0x138] sm:$0xff] }
  0x81   : > { %4750 = vmatmul.mubr.msk.f32.gmra.mrb[22].mxu1 %vm249_vm1, %v5950_v7  ;;  %4976 = vmatmul.mubr.msk.f32.gmra.mrb[6].mxu0 %vm249_vm1, %v5842_v47  ;;  %v5978_v47 = vld [vmem:[%s5447_s25 + $0x140] sm:$0xff] }
  0x82   : > { %4752 = vmatprep.mubr.msk.f32.mxu1 %vm249_vm1, %v5953_v10  ;;  %4978 = vmatprep.mubr.msk.f32.mxu0 %vm249_vm1, %v5848_v43  ;;  %v5981_v43 = vld [vmem:[%s5447_s25 + $0x150] sm:$0xff] }
  0x85   : > { %4753 = vmatmul.mubr.msk.f32.gmra.mrb[24].mxu1 %vm249_vm1, %v5964_v57  ;;  %4979 = vmatmul.mubr.msk.f32.gmra.mrb[8].mxu0 %vm249_vm1, %v5862_v39  ;;  %v5992_v39 = vld [vmem:[%s5447_s25 + $0x158] sm:$0xff] }
  0x86   : > { %4755 = vmatprep.mubr.msk.f32.mxu1 %vm249_vm1, %v5967_v51  ;;  %4981 = vmatprep.mubr.msk.f32.mxu0 %vm249_vm1, %v5868_v35  ;;  %v5995_v35 = vld [vmem:[%s5447_s25 + $0x168] sm:$0xff] }
  0x89   : > { %4756 = vmatmul.mubr.msk.f32.gmra.mrb[26].mxu1 %vm249_vm1, %v5978_v47  ;;  %4982 = vmatmul.mubr.msk.f32.gmra.mrb[10].mxu0 %vm249_vm1, %v5882_v62  ;;  %v6006_v62 = vld [vmem:[%s5447_s25 + $0x170] sm:$0xff] }
  0x8a   : > { %4758 = vmatprep.mubr.msk.f32.mxu1 %vm249_vm1, %v5981_v43  ;;  %4984 = vmatprep.mubr.msk.f32.mxu0 %vm249_vm1, %v5888_v59 }
  0x8d   : > { %4759 = vmatmul.mubr.msk.f32.gmra.mrb[28].mxu1 %vm249_vm1, %v5992_v39  ;;  %4985 = vmatmul.mubr.msk.f32.gmra.mrb[12].mxu0 %vm249_vm1, %v5899_v33  ;;  %v900_v33 = vld [vmem:[%s5447_s25 + $0xa] sm:$0xff] }
  0x8e   : > { %4761 = vmatprep.mubr.msk.f32.mxu1 %vm249_vm1, %v5995_v35  ;;  %4987 = vmatprep.mubr.msk.f32.mxu0 %vm249_vm1, %v5902_v29 }
  0x91   : > { %4762 = vmatmul.mubr.msk.f32.gmra.mrb[30].mxu1 %vm249_vm1, %v6006_v62  ;;  %4988 = vmatmul.mubr.msk.f32.gmra.mrb[14].mxu0 %vm249_vm1, %v5918_v31 }
  0x92   : > { %4766 = vmatprep.mubr.msk.f32.mxu1 %vm249_vm1, %v899_v3  ;;  %4990 = vmatprep.mubr.msk.f32.mxu0 %vm249_vm1, %v5923_v0  ;;  %v6516_v3 = vld [vmem:[#allocation22_spill] sm:$0xff] }
  0x95   : > { %4767 = vmatmul.mubr.msk.f32.vlgmr.msra.gmra.mrb[0].mxu1 %vm249_vm1, %v900_v33  ;;  %4991 = vmatmul.mubr.msk.f32.gmra.mrb[16].mxu0 %vm249_vm1, %v5936_v28  ;;  %v4196_v33 = vld [vmem:[%s5447_s25 + $0x198] sm:$0xff] }
  0x96   : > { %4815 = vmatpush3.msk.msra.mxu1 %vm346_vm0, %v5748_v61  ;;  %4769 = vmatprep.mubr.msk.f32.mxu1 %vm249_vm1, %v5563_v24  ;;  %v6061_v24 = vld [vmem:[%s5447_s25 + $0x180] sm:$0xff] }
  0x97   : > { %4993 = vmatprep.mubr.msk.f32.mxu0 %vm249_vm1, %v5939_v5  ;;  %5114 = vmatprep.subr.msk.mxu1 %vm346_vm0, %v5425_v1  ;;  %v4197_v61 = vld [vmem:[%s5447_s25 + $0x1a0] sm:$0xff] }
  0x99   : > { %4770 = vmatmul.mubr.msk.f32.gmra.mrb[2].mxu1 %vm249_vm1, %v5574_v25  ;;  %4994 = vmatmul.mubr.msk.f32.gmra.mrb[18].mxu0 %vm249_vm1, %v5950_v7  ;;  %v6072_v25 = vld [vmem:[%s5447_s25 + $0x188] sm:$0xff] }
  0x9a   : > { %4772 = vmatprep.mubr.msk.f32.mxu1 %vm249_vm1, %v5580_v27  ;;  %4996 = vmatprep.mubr.msk.f32.mxu0 %vm249_vm1, %v5953_v10 }
  0x9d   : > { %4773 = vmatmul.mubr.msk.f32.gmra.mrb[4].mxu1 %vm249_vm1, %v5598_v30  ;;  %4997 = vmatmul.mubr.msk.f32.gmra.mrb[20].mxu0 %vm249_vm1, %v5964_v57 }
  0x9e   : > { %4775 = vmatprep.mubr.msk.f32.mxu1 %vm249_vm1, %v5606_v32  ;;  %4999 = vmatprep.mubr.msk.f32.mxu0 %vm249_vm1, %v5967_v51 }
  0xa1   : > { %4776 = vmatmul.mubr.msk.f32.gmra.mrb[6].mxu1 %vm249_vm1, %v5622_v34  ;;  %5000 = vmatmul.mubr.msk.f32.gmra.mrb[22].mxu0 %vm249_vm1, %v5978_v47 }
  0xa2   : > { %4778 = vmatprep.mubr.msk.f32.mxu1 %vm249_vm1, %v5628_v36  ;;  %5002 = vmatprep.mubr.msk.f32.mxu0 %vm249_vm1, %v5981_v43 }
  0xa5   : > { %4779 = vmatmul.mubr.msk.f32.gmra.mrb[8].mxu1 %vm249_vm1, %v5642_v38  ;;  %5003 = vmatmul.mubr.msk.f32.gmra.mrb[24].mxu0 %vm249_vm1, %v5992_v39 }
  0xa6   : > { %4781 = vmatprep.mubr.msk.f32.mxu1 %vm249_vm1, %v5648_v40  ;;  %5005 = vmatprep.mubr.msk.f32.mxu0 %vm249_vm1, %v5995_v35 }
  0xa9   : > { %4782 = vmatmul.mubr.msk.f32.gmra.mrb[10].mxu1 %vm249_vm1, %v5662_v42  ;;  %5006 = vmatmul.mubr.msk.f32.gmra.mrb[26].mxu0 %vm249_vm1, %v6006_v62 }
  0xaa   : > { %4784 = vmatprep.mubr.msk.f32.mxu1 %vm249_vm1, %v5668_v44  ;;  %5008 = vmatprep.mubr.msk.f32.mxu0 %vm249_vm1, %v6061_v24 }
  0xad   : > { %4785 = vmatmul.mubr.msk.f32.gmra.mrb[12].mxu1 %vm249_vm1, %v5682_v46  ;;  %5009 = vmatmul.mubr.msk.f32.gmra.mrb[28].mxu0 %vm249_vm1, %v6072_v25 }
  0xae   : > { %4787 = vmatprep.mubr.msk.f32.mxu1 %vm249_vm1, %v5688_v48  ;;  %5011 = vmatprep.mubr.msk.f32.mxu0 %vm249_vm1, %v4196_v33  ;;  %v6517_v33 = vld [vmem:[#allocation10_spill] sm:$0xff] }
  0xb1   : > { %4788 = vmatmul.mubr.msk.f32.gmra.mrb[14].mxu1 %vm249_vm1, %v5702_v50  ;;  %5012 = vmatmul.mubr.msk.f32.gmra.mrb[30].mxu0 %vm249_vm1, %v4197_v61  ;;  %v6518_v61 = vld [vmem:[#allocation23_spill] sm:$0xff] }
  0xb2   : > { %4790 = vmatprep.mubr.msk.f32.mxu1 %vm249_vm1, %v5708_v52  ;;  %5016 = vmatprep.mubr.msk.f32.mxu0 %vm249_vm1, %v5456_v8  ;;  %v6500_v8 = vld [vmem:[#allocation27_spill] sm:$0xff] }
  0xb5   : > { %4791 = vmatmul.mubr.msk.f32.gmra.mrb[16].mxu1 %vm249_vm1, %v5722_v54  ;;  %5017 = vmatmul.mubr.msk.f32.vlgmr.msra.gmra.mrb[0].mxu0 %vm249_vm1, %v5471_v11  ;;  %v6501_v11 = vld [vmem:[#allocation2_spill] sm:$0xff] }
  0xb6   : > { %5065 = vmatpush3.msk.msra.mxu0 %vm346_vm0, %v5907_v37  ;;  %4793 = vmatprep.mubr.msk.f32.mxu1 %vm249_vm1, %v5726_v56  ;;  %v6515_v37 = vld [vmem:[#allocation9_spill] sm:$0xff] }
  0xb7   : > { %5019 = vmatprep.mubr.msk.f32.mxu0 %vm249_vm1, %v5477_v12  ;;  %v6502_v12 = vld [vmem:[#allocation15_spill] sm:$0xff] }
  0xb9   : > { %4794 = vmatmul.mubr.msk.f32.gmra.mrb[18].mxu1 %vm249_vm1, %v5737_v58  ;;  %5020 = vmatmul.mubr.msk.f32.gmra.mrb[2].mxu0 %vm249_vm1, %v5490_v13  ;;  %v6503_v13 = vld [vmem:[#allocation3_spill] sm:$0xff] }
  0xba   : > { %4796 = vmatprep.mubr.msk.f32.mxu1 %vm249_vm1, %v5743_v60  ;;  %5022 = vmatprep.mubr.msk.f32.mxu0 %vm249_vm1, %v5493_v14  ;;  %v6504_v14 = vld [vmem:[#allocation16_spill] sm:$0xff] }
  0xbd   : > { %4797 = vmatmul.mubr.msk.f32.gmra.mrb[20].mxu1 %vm249_vm1, %v5761_v63  ;;  %5023 = vmatmul.mubr.msk.f32.gmra.mrb[4].mxu0 %vm249_vm1, %v5504_v15  ;;  %v6505_v15 = vld [vmem:[#allocation4_spill] sm:$0xff] }
  0xbe   : > { %4799 = vmatprep.mubr.msk.f32.mxu1 %vm249_vm1, %v5769_v2  ;;  %5025 = vmatprep.mubr.msk.f32.mxu0 %vm249_vm1, %v5507_v16  ;;  %v6506_v16 = vld [vmem:[#allocation17_spill] sm:$0xff] }
  0xc1   : > { %4800 = vmatmul.mubr.msk.f32.gmra.mrb[22].mxu1 %vm249_vm1, %v5785_v4  ;;  %5026 = vmatmul.mubr.msk.f32.gmra.mrb[6].mxu0 %vm249_vm1, %v5518_v17  ;;  %v6507_v17 = vld [vmem:[#allocation5_spill] sm:$0xff] }
  0xc2   : > { %4802 = vmatprep.mubr.msk.f32.mxu1 %vm249_vm1, %v5791_v6  ;;  %5028 = vmatprep.mubr.msk.f32.mxu0 %vm249_vm1, %v5521_v18  ;;  %v6508_v18 = vld [vmem:[#allocation18_spill] sm:$0xff] }
  0xc5   : > { %4803 = vmatmul.mubr.msk.f32.gmra.mrb[24].mxu1 %vm249_vm1, %v5805_v9  ;;  %5029 = vmatmul.mubr.msk.f32.gmra.mrb[8].mxu0 %vm249_vm1, %v5532_v19  ;;  %v6509_v19 = vld [vmem:[#allocation6_spill] sm:$0xff] }
  0xc6   : > { %4805 = vmatprep.mubr.msk.f32.mxu1 %vm249_vm1, %v5811_v55  ;;  %5031 = vmatprep.mubr.msk.f32.mxu0 %vm249_vm1, %v5535_v20  ;;  %v6510_v20 = vld [vmem:[#allocation19_spill] sm:$0xff] }
  0xc9   : > { %4806 = vmatmul.mubr.msk.f32.gmra.mrb[26].mxu1 %vm249_vm1, %v5825_v53  ;;  %5032 = vmatmul.mubr.msk.f32.gmra.mrb[10].mxu0 %vm249_vm1, %v5546_v21  ;;  %v6511_v21 = vld [vmem:[#allocation7_spill] sm:$0xff] }
  0xca   : > { %4808 = vmatprep.mubr.msk.f32.mxu1 %vm249_vm1, %v5831_v49  ;;  %5034 = vmatprep.mubr.msk.f32.mxu0 %vm249_vm1, %v5549_v22  ;;  %v6513_v22 = vld [vmem:[#allocation8_spill] sm:$0xff] }
  0xcd   : > { %4809 = vmatmul.mubr.msk.f32.gmra.mrb[28].mxu1 %vm249_vm1, %v5845_v45  ;;  %5035 = vmatmul.mubr.msk.f32.gmra.mrb[12].mxu0 %vm249_vm1, %v5560_v23  ;;  %v6514_v23 = vld [vmem:[#allocation21_spill] sm:$0xff] }
  0xce   : > { %4811 = vmatprep.mubr.msk.f32.mxu1 %vm249_vm1, %v5851_v41  ;;  %5037 = vmatprep.mubr.msk.f32.mxu0 %vm249_vm1, %v5577_v26 }
  0xd1   : > { %4812 = vmatmul.mubr.msk.f32.gmra.mrb[30].mxu1 %vm249_vm1, %v6500_v8  ;;  %5038 = vmatmul.mubr.msk.f32.gmra.mrb[14].mxu0 %vm249_vm1, %v6501_v11  ;;  %v6527_v8 = vld [vmem:[#allocation30_spill] sm:$0xff] }
  0xd2   : > { %4816 = vmatprep.mubr.msk.f32.mxu1 %vm249_vm1, %v6502_v12  ;;  %5040 = vmatprep.mubr.msk.f32.mxu0 %vm249_vm1, %v6503_v13  ;;  %v6519_v12 = vld [vmem:[#allocation11_spill] sm:$0xff] }
  0xd5   : > { %4817 = vmatmul.mubr.msk.f32.vlgmr.msra.gmra.mrb[0].mxu1 %vm249_vm1, %v6504_v14  ;;  %5041 = vmatmul.mubr.msk.f32.gmra.mrb[16].mxu0 %vm249_vm1, %v6505_v15  ;;  %v6520_v14 = vld [vmem:[#allocation24_spill] sm:$0xff] }
  0xd6   : > { %5115 = vmatpush3.msk.msra.mxu1 %vm346_vm0, %v5425_v1  ;;  %4819 = vmatprep.mubr.msk.f32.mxu1 %vm249_vm1, %v6506_v16  ;;  %v6512_v1 = vld [vmem:[#allocation20_spill] sm:$0xff] }
  0xd7   : > { %5043 = vmatprep.mubr.msk.f32.mxu0 %vm249_vm1, %v6507_v17  ;;  %v6521_v16 = vld [vmem:[#allocation12_spill] sm:$0xff] }
  0xd9   : > { %4820 = vmatmul.mubr.msk.f32.gmra.mrb[2].mxu1 %vm249_vm1, %v6508_v18  ;;  %5044 = vmatmul.mubr.msk.f32.gmra.mrb[18].mxu0 %vm249_vm1, %v6509_v19  ;;  %v6522_v18 = vld [vmem:[#allocation25_spill] sm:$0xff] }
  0xda   : > { %4822 = vmatprep.mubr.msk.f32.mxu1 %vm249_vm1, %v6510_v20  ;;  %5046 = vmatprep.mubr.msk.f32.mxu0 %vm249_vm1, %v6511_v21  ;;  %v6523_v20 = vld [vmem:[#allocation13_spill] sm:$0xff] }
  0xdd   : > { %4823 = vmatmul.mubr.msk.f32.gmra.mrb[4].mxu1 %vm249_vm1, %v6512_v1  ;;  %5047 = vmatmul.mubr.msk.f32.gmra.mrb[20].mxu0 %vm249_vm1, %v6513_v22  ;;  %v6199_v1 = vld [vmem:[%s5447_s25 + $0x181] sm:$0xff] }
  0xde   : > { %4825 = vmatprep.mubr.msk.f32.mxu1 %vm249_vm1, %v6514_v23  ;;  %5049 = vmatprep.mubr.msk.f32.mxu0 %vm249_vm1, %v6515_v37  ;;  %v6524_v23 = vld [vmem:[#allocation26_spill] sm:$0xff] }
  0xe1   : > { %4826 = vmatmul.mubr.msk.f32.gmra.mrb[6].mxu1 %vm249_vm1, %v6516_v3  ;;  %5050 = vmatmul.mubr.msk.f32.gmra.mrb[22].mxu0 %vm249_vm1, %v6517_v33  ;;  %v6525_v3 = vld [vmem:[#allocation14_spill] sm:$0xff] }
  0xe2   : > { %4828 = vmatprep.mubr.msk.f32.mxu1 %vm249_vm1, %v6518_v61  ;;  %5052 = vmatprep.mubr.msk.f32.mxu0 %vm249_vm1, %v6519_v12  ;;  %v6526_v61 = vld [vmem:[#allocation28_spill] sm:$0xff] }
  0xe5   : > { %4829 = vmatmul.mubr.msk.f32.gmra.mrb[8].mxu1 %vm249_vm1, %v6520_v14  ;;  %5053 = vmatmul.mubr.msk.f32.gmra.mrb[24].mxu0 %vm249_vm1, %v6521_v16  ;;  %v6210_v14 = vld [vmem:[%s5447_s25 + $0x189] sm:$0xff] }
  0xe6   : > { %4831 = vmatprep.mubr.msk.f32.mxu1 %vm249_vm1, %v6522_v18  ;;  %5055 = vmatprep.mubr.msk.f32.mxu0 %vm249_vm1, %v6523_v20  ;;  %v4262_v18 = vld [vmem:[%s5447_s25 + $0x199] sm:$0xff] }
  0xe9   : > { %4832 = vmatmul.mubr.msk.f32.gmra.mrb[10].mxu1 %vm249_vm1, %v6524_v23  ;;  %5056 = vmatmul.mubr.msk.f32.gmra.mrb[26].mxu0 %vm249_vm1, %v6525_v3  ;;  %v4263_v23 = vld [vmem:[%s5447_s25 + $0x1a1] sm:$0xff]  ;;  %v6528_v3 = vld [vmem:[#allocation32_spill] sm:$0xff] }
  0xea   : > { %4834 = vmatprep.mubr.msk.f32.mxu1 %vm249_vm1, %v6526_v61  ;;  %5058 = vmatprep.mubr.msk.f32.mxu0 %vm249_vm1, %v6199_v1 }
  0xed   : > { %4835 = vmatmul.mubr.msk.f32.gmra.mrb[12].mxu1 %vm249_vm1, %v6527_v8  ;;  %5059 = vmatmul.mubr.msk.f32.gmra.mrb[28].mxu0 %vm249_vm1, %v6210_v14 }
  0xee   : > { %4837 = vmatprep.mubr.msk.f32.mxu1 %vm249_vm1, %v5888_v59  ;;  %5061 = vmatprep.mubr.msk.f32.mxu0 %vm249_vm1, %v4262_v18 }
  0xf1   : > { %4838 = vmatmul.mubr.msk.f32.gmra.mrb[14].mxu1 %vm249_vm1, %v6528_v3  ;;  %5062 = vmatmul.mubr.msk.f32.gmra.mrb[30].mxu0 %vm249_vm1, %v4263_v23 }
  0xf2   : > { %4840 = vmatprep.mubr.msk.f32.mxu1 %vm249_vm1, %v5902_v29  ;;  %5066 = vmatprep.mubr.msk.f32.mxu0 %vm249_vm1, %v5580_v27  ;;  %v6530_v27 = vld [vmem:[#allocation29_spill] sm:$0xff] }
  0xf3   : > { %v4328_v29 = vld [vmem:[%s5447_s25 + $0x19a] sm:$0xff] }
  0xf5   : > { %4841 = vmatmul.mubr.msk.f32.gmra.mrb[16].mxu1 %vm249_vm1, %v5918_v31  ;;  %5067 = vmatmul.mubr.msk.f32.vlgmr.msra.gmra.mrb[0].mxu0 %vm249_vm1, %v5598_v30  ;;  %v6531_v30 = vld [vmem:[#allocation14_spill] sm:$0xff]  ;;  %v6532_v31 = vld [vmem:[#allocation31_spill] sm:$0xff] }
  0xf6   : > { %4843 = vmatprep.mubr.msk.f32.mxu1 %vm249_vm1, %v5923_v0  ;;  %5069 = vmatprep.mubr.msk.f32.mxu0 %vm249_vm1, %v5606_v32  ;;  %v4329_v32 = vld [vmem:[%s5447_s25 + $0x1a2] sm:$0xff] }
  0xf9   : > { %4844 = vmatmul.mubr.msk.f32.gmra.mrb[18].mxu1 %vm249_vm1, %v5936_v28  ;;  %5070 = vmatmul.mubr.msk.f32.gmra.mrb[2].mxu0 %vm249_vm1, %v5622_v34  ;;  %v5390_v34 = vmov 0.0  }
  0xfa   : > { %4846 = vmatprep.mubr.msk.f32.mxu1 %vm249_vm1, %v5939_v5  ;;  %5072 = vmatprep.mubr.msk.f32.mxu0 %vm249_vm1, %v5628_v36  ;;  %3663 = vst [vmem:[%s6356_s14] sm:$0xff] %v5390_v34 }
  0xfd   : > { %4847 = vmatmul.mubr.msk.f32.gmra.mrb[20].mxu1 %vm249_vm1, %v5950_v7  ;;  %5073 = vmatmul.mubr.msk.f32.gmra.mrb[4].mxu0 %vm249_vm1, %v5642_v38 }
  0xfe   : > { %4849 = vmatprep.mubr.msk.f32.mxu1 %vm249_vm1, %v5953_v10  ;;  %5075 = vmatprep.mubr.msk.f32.mxu0 %vm249_vm1, %v5648_v40 }
 0x101   : > { %4850 = vmatmul.mubr.msk.f32.gmra.mrb[22].mxu1 %vm249_vm1, %v5964_v57  ;;  %5076 = vmatmul.mubr.msk.f32.gmra.mrb[6].mxu0 %vm249_vm1, %v5662_v42 }
 0x102   : > { %4852 = vmatprep.mubr.msk.f32.mxu1 %vm249_vm1, %v5967_v51  ;;  %5078 = vmatprep.mubr.msk.f32.mxu0 %vm249_vm1, %v5668_v44 }
 0x105   : > { %4853 = vmatmul.mubr.msk.f32.gmra.mrb[24].mxu1 %vm249_vm1, %v5978_v47  ;;  %5079 = vmatmul.mubr.msk.f32.gmra.mrb[8].mxu0 %vm249_vm1, %v5682_v46 }
 0x106   : > { %4855 = vmatprep.mubr.msk.f32.mxu1 %vm249_vm1, %v5981_v43  ;;  %5081 = vmatprep.mubr.msk.f32.mxu0 %vm249_vm1, %v5688_v48 }
 0x109   : > { %4856 = vmatmul.mubr.msk.f32.gmra.mrb[26].mxu1 %vm249_vm1, %v5992_v39  ;;  %5082 = vmatmul.mubr.msk.f32.gmra.mrb[10].mxu0 %vm249_vm1, %v5702_v50 }
 0x10a   : > { %4858 = vmatprep.mubr.msk.f32.mxu1 %vm249_vm1, %v5995_v35  ;;  %5084 = vmatprep.mubr.msk.f32.mxu0 %vm249_vm1, %v5708_v52 }
 0x10d   : > { %4859 = vmatmul.mubr.msk.f32.gmra.mrb[28].mxu1 %vm249_vm1, %v6006_v62  ;;  %5085 = vmatmul.mubr.msk.f32.gmra.mrb[12].mxu0 %vm249_vm1, %v5722_v54 }
 0x10e   : > { %4861 = vmatprep.mubr.msk.f32.mxu1 %vm249_vm1, %v6061_v24  ;;  %5087 = vmatprep.mubr.msk.f32.mxu0 %vm249_vm1, %v5726_v56 }
 0x111   : > { %4862 = vmatmul.mubr.msk.f32.gmra.mrb[30].mxu1 %vm249_vm1, %v6072_v25  ;;  %5088 = vmatmul.mubr.msk.f32.gmra.mrb[14].mxu0 %vm249_vm1, %v5737_v58 }
 0x112   : > { %4890 = vmatprep.mubr.msk.f32.mxu1 %vm249_vm1, %v5577_v26  ;;  %5090 = vmatprep.mubr.msk.f32.mxu0 %vm249_vm1, %v5743_v60  ;;  %v6529_v26 = vld [vmem:[#allocation27_spill] sm:$0xff] }
 0x115   : > { %4891 = vmatmul.mubr.msk.f32.vlgmr.msra.gmra.mrb[16].mxu1 %vm249_vm1, %v6501_v11  ;;  %5091 = vmatmul.mubr.msk.f32.gmra.mrb[16].mxu0 %vm249_vm1, %v5761_v63 }
 0x116   : > { %4893 = vmatprep.mubr.msk.f32.mxu1 %vm249_vm1, %v6503_v13  ;;  %5093 = vmatprep.mubr.msk.f32.mxu0 %vm249_vm1, %v5769_v2 }
 0x119   : > { %4894 = vmatmul.mubr.msk.f32.gmra.mrb[18].mxu1 %vm249_vm1, %v6505_v15  ;;  %5094 = vmatmul.mubr.msk.f32.gmra.mrb[18].mxu0 %vm249_vm1, %v5785_v4 }
 0x11a   : > { %4896 = vmatprep.mubr.msk.f32.mxu1 %vm249_vm1, %v6507_v17  ;;  %5096 = vmatprep.mubr.msk.f32.mxu0 %vm249_vm1, %v5791_v6 }
 0x11d   : > { %4897 = vmatmul.mubr.msk.f32.gmra.mrb[20].mxu1 %vm249_vm1, %v6509_v19  ;;  %5097 = vmatmul.mubr.msk.f32.gmra.mrb[20].mxu0 %vm249_vm1, %v5805_v9 }
 0x11e   : > { %4899 = vmatprep.mubr.msk.f32.mxu1 %vm249_vm1, %v6511_v21  ;;  %5099 = vmatprep.mubr.msk.f32.mxu0 %vm249_vm1, %v5811_v55 }
 0x121   : > { %4900 = vmatmul.mubr.msk.f32.gmra.mrb[22].mxu1 %vm249_vm1, %v6513_v22  ;;  %5100 = vmatmul.mubr.msk.f32.gmra.mrb[22].mxu0 %vm249_vm1, %v5825_v53 }
 0x122   : > { %4902 = vmatprep.mubr.msk.f32.mxu1 %vm249_vm1, %v6515_v37  ;;  %5102 = vmatprep.mubr.msk.f32.mxu0 %vm249_vm1, %v5831_v49 }
 0x125   : > { %4903 = vmatmul.mubr.msk.f32.gmra.mrb[24].mxu1 %vm249_vm1, %v6517_v33  ;;  %5103 = vmatmul.mubr.msk.f32.gmra.mrb[24].mxu0 %vm249_vm1, %v5845_v45 }
 0x126   : > { %4905 = vmatprep.mubr.msk.f32.mxu1 %vm249_vm1, %v6519_v12  ;;  %5105 = vmatprep.mubr.msk.f32.mxu0 %vm249_vm1, %v5851_v41 }
 0x129   : > { %4906 = vmatmul.mubr.msk.f32.gmra.mrb[26].mxu1 %vm249_vm1, %v6521_v16  ;;  %5106 = vmatmul.mubr.msk.f32.gmra.mrb[26].mxu0 %vm249_vm1, %v6529_v26 }
 0x12a   : > { %4908 = vmatprep.mubr.msk.f32.mxu1 %vm249_vm1, %v6523_v20  ;;  %5108 = vmatprep.mubr.msk.f32.mxu0 %vm249_vm1, %v6530_v27 }
 0x12d   : > { %4909 = vmatmul.mubr.msk.f32.gmra.mrb[28].mxu1 %vm249_vm1, %v6531_v30  ;;  %5109 = vmatmul.mubr.msk.f32.gmra.mrb[28].mxu0 %vm249_vm1, %v6532_v31 }
 0x12e   : > { %4911 = vmatprep.mubr.msk.f32.mxu1 %vm249_vm1, %v6199_v1  ;;  %5111 = vmatprep.mubr.msk.f32.mxu0 %vm249_vm1, %v4328_v29 }
 0x131   : > { %4912 = vmatmul.mubr.msk.f32.gmra.mrb[30].mxu1 %vm249_vm1, %v6210_v14  ;;  %5112 = vmatmul.mubr.msk.f32.gmra.mrb[30].mxu0 %vm249_vm1, %v4329_v32 }
 0x1a8   : > { %v4818_v35 = vpop.f32.mrb[0].mxu1 }
 0x1a9   : > { %v1489_v36 = vpop.f32.mrb[1].mxu1 }
 0x1ac   : > { %v4821_v38 = vpop.f32.mrb[2].mxu1 }
 0x1ad   : > { %v1499_v39 = vpop.f32.mrb[3].mxu1 }
 0x1b0   : > { %v4824_v40 = vpop.f32.mrb[4].mxu1 }
 0x1b1   : > { %v1509_v41 = vpop.f32.mrb[5].mxu1 }
 0x1b4   : > { %v4827_v42 = vpop.f32.mrb[6].mxu1 }
 0x1b5   : > { %v1519_v43 = vpop.f32.mrb[7].mxu1 }
 0x1b8   : > { %v4830_v44 = vpop.f32.mrb[8].mxu1 }
 0x1b9   : > { %v1529_v45 = vpop.f32.mrb[9].mxu1 }
 0x1bc   : > { %v6359_v46 = vpop.f32.mrb[10].mxu1 }
 0x1bd   : > { %v6361_v47 = vpop.f32.mrb[11].mxu1 }
 0x1c0   : > { %v6363_v48 = vpop.f32.mrb[12].mxu1 }
 0x1c1   : > { %v6365_v49 = vpop.f32.mrb[13].mxu1 }
 0x1c4   : > { %v6367_v50 = vpop.f32.mrb[14].mxu1 }
 0x1c5   : > { %v6369_v51 = vpop.f32.mrb[15].mxu1 }
 0x1c8   : > { %v5068_v52 = vpop.f32.mrb[0].mxu0 }
 0x1c9   : > { %v5116_v53 = vadd.f32 %v5068_v52, %v4818_v35  ;;  %v3440_v54 = vpop.f32.mrb[1].mxu0 }
 0x1ca   : > { %v5117_v56 = vadd.f32 %v3440_v54, %v1489_v36 }
 0x1cb   : > { %3632 = vst [vmem:[%s6375_s18 + $0x8] sm:$0xff] %v5116_v53  ;;  %v3703_v58 = vmul.f32 %v5116_v53, %v5116_v53 }
 0x1cc   : > { %3631 = vst [vmem:[%s6375_s18] sm:$0xff] %v5117_v56  ;;  %v3664_v59 = vadd.f32 %v5117_v56, %v5116_v53  ;;  %v3702_v60 = vmul.f32 %v5117_v56, %v5117_v56  ;;  %v5071_v62 = vpop.f32.mrb[2].mxu0 }
 0x1cd   : > { %v5118_v63 = vadd.f32 %v5071_v62, %v4821_v38  ;;  %v3450_v0 = vpop.f32.mrb[3].mxu0 }
 0x1ce   : > { %v3734_v2 = vadd.f32 %v3703_v58, %v3702_v60  ;;  %v5119_v4 = vadd.f32 %v3450_v0, %v1499_v39 }
 0x1cf   : > { %3634 = vst [vmem:[%s6375_s18 + $0x18] sm:$0xff] %v5118_v63  ;;  %v3705_v55 = vmul.f32 %v5118_v63, %v5118_v63 }
 0x1d0   : > { %3633 = vst [vmem:[%s6375_s18 + $0x10] sm:$0xff] %v5119_v4  ;;  %v3665_v5 = vadd.f32 %v5119_v4, %v3664_v59  ;;  %v3704_v6 = vmul.f32 %v5119_v4, %v5119_v4  ;;  %v5074_v7 = vpop.f32.mrb[4].mxu0 }
 0x1d1   : > { %v5120_v9 = vadd.f32 %v5074_v7, %v4824_v40  ;;  %v3460_v10 = vpop.f32.mrb[5].mxu0 }
 0x1d2   : > { %v3735_v57 = vadd.f32 %v3734_v2, %v3704_v6  ;;  %v5121_v28 = vadd.f32 %v3460_v10, %v1509_v41  ;;  %v3666_v24 = vadd.f32 %v5118_v63, %v3665_v5 }
 0x1d3   : > { %3636 = vst [vmem:[%s6375_s18 + $0x28] sm:$0xff] %v5120_v9  ;;  %v3707_v19 = vmul.f32 %v5120_v9, %v5120_v9 }
 0x1d4   : > { %3635 = vst [vmem:[%s6375_s18 + $0x20] sm:$0xff] %v5121_v28  ;;  %v3667_v25 = vadd.f32 %v5121_v28, %v3666_v24  ;;  %v3706_v8 = vmul.f32 %v5121_v28, %v5121_v28  ;;  %v3736_v11 = vadd.f32 %v3735_v57, %v3705_v55  ;;  %v5077_v13 = vpop.f32.mrb[6].mxu0 }
 0x1d5   : > { %v5122_v15 = vadd.f32 %v5077_v13, %v4827_v42  ;;  %v3470_v17 = vpop.f32.mrb[7].mxu0 }
 0x1d6   : > { %v3737_v21 = vadd.f32 %v3736_v11, %v3706_v8  ;;  %v5123_v22 = vadd.f32 %v3470_v17, %v1519_v43  ;;  %v3668_v37 = vadd.f32 %v5120_v9, %v3667_v25 }
 0x1d7   : > { %3638 = vst [vmem:[%s6375_s18 + $0x38] sm:$0xff] %v5122_v15  ;;  %v3709_v61 = vmul.f32 %v5122_v15, %v5122_v15 }
 0x1d8   : > { %3637 = vst [vmem:[%s6375_s18 + $0x30] sm:$0xff] %v5123_v22  ;;  %v3669_v33 = vadd.f32 %v5123_v22, %v3668_v37  ;;  %v3708_v12 = vmul.f32 %v5123_v22, %v5123_v22  ;;  %v3738_v16 = vadd.f32 %v3737_v21, %v3707_v19  ;;  %v5080_v20 = vpop.f32.mrb[8].mxu0 }
 0x1d9   : > { %v5124_v1 = vadd.f32 %v5080_v20, %v4830_v44  ;;  %v3480_v3 = vpop.f32.mrb[9].mxu0 }
 0x1da   : > { %v3739_v14 = vadd.f32 %v3738_v16, %v3708_v12  ;;  %v5125_v18 = vadd.f32 %v3480_v3, %v1529_v45  ;;  %v3670_v23 = vadd.f32 %v5122_v15, %v3669_v33 }
 0x1db   : > { %3640 = vst [vmem:[%s6375_s18 + $0x48] sm:$0xff] %v5124_v1  ;;  %v3711_v34 = vmul.f32 %v5124_v1, %v5124_v1 }
 0x1dc   : > { %3639 = vst [vmem:[%s6375_s18 + $0x40] sm:$0xff] %v5125_v18  ;;  %v3671_v26 = vadd.f32 %v5125_v18, %v3670_v23  ;;  %v3710_v27 = vmul.f32 %v5125_v18, %v5125_v18  ;;  %v3740_v29 = vadd.f32 %v3739_v14, %v3709_v61  ;;  %v5083_v30 = vpop.f32.mrb[10].mxu0 }
 0x1dd   : > { %v5126_v31 = vadd.f32 %v5083_v30, %v6359_v46  ;;  %v3490_v32 = vpop.f32.mrb[11].mxu0 }
 0x1de   : > { %v3741_v35 = vadd.f32 %v3740_v29, %v3710_v27  ;;  %v5127_v36 = vadd.f32 %v3490_v32, %v6361_v47  ;;  %v3672_v38 = vadd.f32 %v5124_v1, %v3671_v26 }
 0x1df   : > { %3642 = vst [vmem:[%s6375_s18 + $0x58] sm:$0xff] %v5126_v31  ;;  %v3713_v45 = vmul.f32 %v5126_v31, %v5126_v31 }
 0x1e0   : > { %3641 = vst [vmem:[%s6375_s18 + $0x50] sm:$0xff] %v5127_v36  ;;  %v3673_v39 = vadd.f32 %v5127_v36, %v3672_v38  ;;  %v3712_v40 = vmul.f32 %v5127_v36, %v5127_v36  ;;  %v3742_v41 = vadd.f32 %v3741_v35, %v3711_v34  ;;  %v5086_v42 = vpop.f32.mrb[12].mxu0 }
 0x1e1   : > { %v5128_v43 = vadd.f32 %v5086_v42, %v6363_v48  ;;  %v3500_v44 = vpop.f32.mrb[13].mxu0 }
 0x1e2   : > { %v3743_v46 = vadd.f32 %v3742_v41, %v3712_v40  ;;  %v5129_v52 = vadd.f32 %v3500_v44, %v6365_v49  ;;  %v3674_v53 = vadd.f32 %v5126_v31, %v3673_v39 }
 0x1e3   : > { %3644 = vst [vmem:[%s6375_s18 + $0x68] sm:$0xff] %v5128_v43  ;;  %v3715_v62 = vmul.f32 %v5128_v43, %v5128_v43 }
 0x1e4   : > { %3643 = vst [vmem:[%s6375_s18 + $0x60] sm:$0xff] %v5129_v52  ;;  %v3675_v47 = vadd.f32 %v5129_v52, %v3674_v53  ;;  %v3714_v54 = vmul.f32 %v5129_v52, %v5129_v52  ;;  %v3744_v56 = vadd.f32 %v3743_v46, %v3713_v45  ;;  %v5089_v58 = vpop.f32.mrb[14].mxu0 }
 0x1e5   : > { %v5130_v59 = vadd.f32 %v5089_v58, %v6367_v50  ;;  %v3510_v60 = vpop.f32.mrb[15].mxu0 }
 0x1e6   : > { %v3745_v63 = vadd.f32 %v3744_v56, %v3714_v54  ;;  %v5131_v48 = vadd.f32 %v3510_v60, %v6369_v51  ;;  %v3676_v0 = vadd.f32 %v5128_v43, %v3675_v47 }
 0x1e7   : > { %3646 = vst [vmem:[%s6375_s18 + $0x78] sm:$0xff] %v5130_v59  ;;  %v3717_v55 = vmul.f32 %v5130_v59, %v5130_v59 }
 0x1e8   : > { %3645 = vst [vmem:[%s6375_s18 + $0x70] sm:$0xff] %v5131_v48  ;;  %v3677_v49 = vadd.f32 %v5131_v48, %v3676_v0  ;;  %v3716_v2 = vmul.f32 %v5131_v48, %v5131_v48  ;;  %v3746_v4 = vadd.f32 %v3745_v63, %v3715_v62  ;;  %v4892_v5 = vpop.f32.mrb[16].mxu1  ;;  %v5092_v6 = vpop.f32.mrb[16].mxu0 }
 0x1e9   : > { %v5132_v7 = vadd.f32 %v5092_v6, %v4892_v5  ;;  %v1959_v9 = vpop.f32.mrb[17].mxu1  ;;  %v3520_v10 = vpop.f32.mrb[17].mxu0 }
 0x1ea   : > { %v3747_v50 = vadd.f32 %v3746_v4, %v3716_v2  ;;  %v5133_v57 = vadd.f32 %v3520_v10, %v1959_v9  ;;  %v3678_v28 = vadd.f32 %v5130_v59, %v3677_v49 }
 0x1eb   : > { %3648 = vst [vmem:[%s6375_s18 + $0x88] sm:$0xff] %v5132_v7  ;;  %v3719_v19 = vmul.f32 %v5132_v7, %v5132_v7 }
 0x1ec   : > { %3647 = vst [vmem:[%s6375_s18 + $0x80] sm:$0xff] %v5133_v57  ;;  %v3679_v51 = vadd.f32 %v5133_v57, %v3678_v28  ;;  %v3718_v24 = vmul.f32 %v5133_v57, %v5133_v57  ;;  %v3748_v25 = vadd.f32 %v3747_v50, %v3717_v55  ;;  %v4895_v8 = vpop.f32.mrb[18].mxu1  ;;  %v5095_v11 = vpop.f32.mrb[18].mxu0 }
 0x1ed   : > { %v5134_v13 = vadd.f32 %v5095_v11, %v4895_v8  ;;  %v1969_v15 = vpop.f32.mrb[19].mxu1  ;;  %v3530_v17 = vpop.f32.mrb[19].mxu0 }
 0x1ee   : > { %v3749_v21 = vadd.f32 %v3748_v25, %v3718_v24  ;;  %v5135_v22 = vadd.f32 %v3530_v17, %v1969_v15  ;;  %v3680_v37 = vadd.f32 %v5132_v7, %v3679_v51 }
 0x1ef   : > { %3650 = vst [vmem:[%s6375_s18 + $0x98] sm:$0xff] %v5134_v13  ;;  %v3721_v18 = vmul.f32 %v5134_v13, %v5134_v13 }
 0x1f0   : > { %3649 = vst [vmem:[%s6375_s18 + $0x90] sm:$0xff] %v5135_v22  ;;  %v3681_v33 = vadd.f32 %v5135_v22, %v3680_v37  ;;  %v3720_v12 = vmul.f32 %v5135_v22, %v5135_v22  ;;  %v3750_v16 = vadd.f32 %v3749_v21, %v3719_v19  ;;  %v4898_v20 = vpop.f32.mrb[20].mxu1  ;;  %v5098_v1 = vpop.f32.mrb[20].mxu0 }
 0x1f1   : > { %v5136_v3 = vadd.f32 %v5098_v1, %v4898_v20  ;;  %v1979_v61 = vpop.f32.mrb[21].mxu1  ;;  %v3540_v14 = vpop.f32.mrb[21].mxu0 }
 0x1f2   : > { %v3751_v23 = vadd.f32 %v3750_v16, %v3720_v12  ;;  %v5137_v26 = vadd.f32 %v3540_v14, %v1979_v61  ;;  %v3682_v27 = vadd.f32 %v5134_v13, %v3681_v33 }
 0x1f3   : > { %3652 = vst [vmem:[%s6375_s18 + $0xa8] sm:$0xff] %v5136_v3  ;;  %v3723_v39 = vmul.f32 %v5136_v3, %v5136_v3 }
 0x1f4   : > { %3651 = vst [vmem:[%s6375_s18 + $0xa0] sm:$0xff] %v5137_v26  ;;  %v3683_v29 = vadd.f32 %v5137_v26, %v3682_v27  ;;  %v3722_v30 = vmul.f32 %v5137_v26, %v5137_v26  ;;  %v3752_v31 = vadd.f32 %v3751_v23, %v3721_v18  ;;  %v4901_v32 = vpop.f32.mrb[22].mxu1  ;;  %v5101_v34 = vpop.f32.mrb[22].mxu0 }
 0x1f5   : > { %v5138_v35 = vadd.f32 %v5101_v34, %v4901_v32  ;;  %v1989_v36 = vpop.f32.mrb[23].mxu1  ;;  %v3550_v38 = vpop.f32.mrb[23].mxu0 }
 0x1f6   : > { %v3753_v40 = vadd.f32 %v3752_v31, %v3722_v30  ;;  %v5139_v41 = vadd.f32 %v3550_v38, %v1989_v36  ;;  %v3684_v42 = vadd.f32 %v5136_v3, %v3683_v29 }
 0x1f7   : > { %3654 = vst [vmem:[%s6375_s18 + $0xb8] sm:$0xff] %v5138_v35  ;;  %v3725_v56 = vmul.f32 %v5138_v35, %v5138_v35 }
 0x1f8   : > { %3653 = vst [vmem:[%s6375_s18 + $0xb0] sm:$0xff] %v5139_v41  ;;  %v3685_v43 = vadd.f32 %v5139_v41, %v3684_v42  ;;  %v3724_v44 = vmul.f32 %v5139_v41, %v5139_v41  ;;  %v3754_v45 = vadd.f32 %v3753_v40, %v3723_v39  ;;  %v4904_v46 = vpop.f32.mrb[24].mxu1  ;;  %v5104_v52 = vpop.f32.mrb[24].mxu0 }
 0x1f9   : > { %v5140_v53 = vadd.f32 %v5104_v52, %v4904_v46  ;;  %v1999_v47 = vpop.f32.mrb[25].mxu1  ;;  %v3560_v54 = vpop.f32.mrb[25].mxu0 }
 0x1fa   : > { %v3755_v58 = vadd.f32 %v3754_v45, %v3724_v44  ;;  %v5141_v59 = vadd.f32 %v3560_v54, %v1999_v47  ;;  %v3686_v60 = vadd.f32 %v5138_v35, %v3685_v43 }
 0x1fb   : > { %3656 = vst [vmem:[%s6375_s18 + $0xc8] sm:$0xff] %v5140_v53  ;;  %v3727_v6 = vmul.f32 %v5140_v53, %v5140_v53 }
 0x1fc   : > { %3655 = vst [vmem:[%s6375_s18 + $0xc0] sm:$0xff] %v5141_v59  ;;  %v3687_v62 = vadd.f32 %v5141_v59, %v3686_v60  ;;  %v3726_v63 = vmul.f32 %v5141_v59, %v5141_v59  ;;  %v3756_v48 = vadd.f32 %v3755_v58, %v3725_v56  ;;  %v4907_v0 = vpop.f32.mrb[26].mxu1  ;;  %v5107_v49 = vpop.f32.mrb[26].mxu0 }
 0x1fd   : > { %v5142_v2 = vadd.f32 %v5107_v49, %v4907_v0  ;;  %v2009_v4 = vpop.f32.mrb[27].mxu1  ;;  %v3570_v5 = vpop.f32.mrb[27].mxu0 }
 0x1fe   : > { %v3757_v7 = vadd.f32 %v3756_v48, %v3726_v63  ;;  %v5143_v9 = vadd.f32 %v3570_v5, %v2009_v4  ;;  %v3688_v10 = vadd.f32 %v5140_v53, %v3687_v62 }
 0x1ff   : > { %3658 = vst [vmem:[%s6375_s18 + $0xd8] sm:$0xff] %v5142_v2  ;;  %v3729_v11 = vmul.f32 %v5142_v2, %v5142_v2 }
 0x200   : > { %3657 = vst [vmem:[%s6375_s18 + $0xd0] sm:$0xff] %v5143_v9  ;;  %v3689_v55 = vadd.f32 %v5143_v9, %v3688_v10  ;;  %v3728_v50 = vmul.f32 %v5143_v9, %v5143_v9  ;;  %v3758_v57 = vadd.f32 %v3757_v7, %v3727_v6  ;;  %v4910_v28 = vpop.f32.mrb[28].mxu1  ;;  %v5110_v51 = vpop.f32.mrb[28].mxu0 }
 0x201   : > { %v5144_v24 = vadd.f32 %v5110_v51, %v4910_v28  ;;  %v2019_v25 = vpop.f32.mrb[29].mxu1  ;;  %v3580_v8 = vpop.f32.mrb[29].mxu0 }
 0x202   : > { %v3759_v13 = vadd.f32 %v3758_v57, %v3728_v50  ;;  %v5145_v15 = vadd.f32 %v3580_v8, %v2019_v25  ;;  %v3690_v17 = vadd.f32 %v5142_v2, %v3689_v55 }
 0x203   : > { %3660 = vst [vmem:[%s6375_s18 + $0xe8] sm:$0xff] %v5144_v24  ;;  %v3731_v1 = vmul.f32 %v5144_v24, %v5144_v24 }
 0x204   : > { %3659 = vst [vmem:[%s6375_s18 + $0xe0] sm:$0xff] %v5145_v15  ;;  %v3691_v19 = vadd.f32 %v5145_v15, %v3690_v17  ;;  %v3730_v21 = vmul.f32 %v5145_v15, %v5145_v15  ;;  %v3760_v22 = vadd.f32 %v3759_v13, %v3729_v11  ;;  %v4913_v37 = vpop.f32.mrb[30].mxu1  ;;  %v5113_v33 = vpop.f32.mrb[30].mxu0 }
 0x205   : > { %v5146_v12 = vadd.f32 %v5113_v33, %v4913_v37  ;;  %v2029_v16 = vpop.f32.mrb[31].mxu1  ;;  %v3590_v20 = vpop.f32.mrb[31].mxu0 }
 0x206   : > { %v3761_v3 = vadd.f32 %v3760_v22, %v3730_v21  ;;  %v5147_v61 = vadd.f32 %v3590_v20, %v2029_v16  ;;  %v3692_v14 = vadd.f32 %v5144_v24, %v3691_v19 }
 0x207   : > { %3662 = vst [vmem:[%s6375_s18 + $0xf8] sm:$0xff] %v5146_v12  ;;  %v3733_v27 = vmul.f32 %v5146_v12, %v5146_v12 }
 0x208   : > { %3661 = vst [vmem:[%s6375_s18 + $0xf0] sm:$0xff] %v5147_v61  ;;  %v3693_v18 = vadd.f32 %v5147_v61, %v3692_v14  ;;  %v3732_v23 = vmul.f32 %v5147_v61, %v5147_v61  ;;  %v3762_v26 = vadd.f32 %v3761_v3, %v3731_v1 }
 0x20a   : > { %v3694_v29 = vadd.f32 %v5146_v12, %v3693_v18  ;;  %v3763_v30 = vadd.f32 %v3762_v26, %v3732_v23 }
 0x20c   : > { %v3695_v31 = vrot.slane %v3694_v29, 4  ;;  %v3764_v32 = vadd.f32 %v3763_v30, %v3733_v27 }
 0x20e   : > { %v3696_v34 = vadd.f32 %v3695_v31, %v3694_v29  ;;  %v3765_v35 = vrot.slane %v3764_v32, 4 }
 0x210   : > { %v3697_v36 = vrot.slane %v3696_v34, 2  ;;  %v3766_v38 = vadd.f32 %v3765_v35, %v3764_v32 }
 0x212   : > { %v3698_v39 = vadd.f32 %v3697_v36, %v3696_v34  ;;  %v3767_v40 = vrot.slane %v3766_v38, 2 }
 0x214   : > { %v3699_v41 = vrot.slane %v3698_v39, 1  ;;  %v3768_v42 = vadd.f32 %v3767_v40, %v3766_v38 }
 0x216   : > { %v3700_v43 = vadd.f32 %v3699_v41, %v3698_v39  ;;  %v3769_v44 = vrot.slane %v3768_v42, 1 }
 0x218   : > { %3701 = vst [vmem:[%s6356_s14] sm:$0x1] %v3700_v43  ;;  %v3770_v45 = vadd.f32 %v3769_v44, %v3768_v42 }
 0x21a   : > { %3771 = vst [vmem:[%s6356_s14 + $0x1] sm:$0x1] %v3770_v45 }
 0x21b PF: > { %s14_s12 = sadd.s32 1, %s5388_s12  }
 0x21c   : > { %p11_p4 = scmp.ge.s32.totalorder %s14_s12, 4  }
 0x21e   :  { %13 = sbr.rel (!%p11_p4) target bundleno = 1 (0x1), region = 80 }

</bundles_post_ra>
